<compile_context>
chip_gen: v7x
topology: tpu7x:2x2x1
jax: 0.10.0
libtpu: 0.0.40
codegen_flags: <defaults>
</compile_context>

<pallas_src>
import functools

import jax
import jax.numpy as jnp
from jax.experimental import pallas as pl
from jax.experimental.pallas import tpu as pltpu


def _largest_divisor_leq(n: int, cap: int) -> int:
    for d in range(min(n, cap), 0, -1):
        if n % d == 0:
            return d
    return 1


def mha_kernel(q_ref, k_ref, v_ref, mask_ref,
               wq_ref, bq_ref, wk_ref, bk_ref, wv_ref, bv_ref, wo_ref, bo_ref,
               out_ref, *, num_heads, head_dim):
    H, hd = num_heads, head_dim
    Bt, Tq, D = q_ref.shape          # batch tile, query tile, d_model
    S = k_ref.shape[1]               # full key/value sequence length
    cdt = q_ref.dtype                # bf16 compute dtype for MXU operands

    # ---- Q/K/V projections: fold (batch, seq) into the sublane axis so each
    # projection is a single wide (Bt*seq, D) x (D, D) MXU pass; f32 accumulate.
    q2 = q_ref[...].reshape(Bt * Tq, D)
    k2 = k_ref[...].reshape(Bt * S, D)
    v2 = v_ref[...].reshape(Bt * S, D)

    Q = jnp.dot(q2, wq_ref[...], preferred_element_type=jnp.float32) + bq_ref[...]
    K = jnp.dot(k2, wk_ref[...], preferred_element_type=jnp.float32) + bk_ref[...]
    V = jnp.dot(v2, wv_ref[...], preferred_element_type=jnp.float32) + bv_ref[...]

    # ---- Head split into a single batched (Bt*H, seq, hd) layout.
    scale = jnp.float32(1.0) / jnp.sqrt(jnp.float32(hd))
    Qh = jnp.transpose((Q * scale).reshape(Bt, Tq, H, hd), (0, 2, 1, 3))
    Qh = Qh.reshape(Bt * H, Tq, hd).astype(cdt)
    Kh = jnp.transpose(K.reshape(Bt, S, H, hd), (0, 2, 1, 3))
    Kh = Kh.reshape(Bt * H, S, hd).astype(cdt)
    Vh = jnp.transpose(V.reshape(Bt, S, H, hd), (0, 2, 1, 3))
    Vh = Vh.reshape(Bt * H, S, hd).astype(cdt)

    # ---- Additive mask bias, computed once and shared by every head.
    # mask is int8 with 1 = keep, 0 = masked  ->  bias = 0 or -1e9.
    bias = (mask_ref[...].astype(jnp.float32) - 1.0) * jnp.float32(1e9)      # (Bt,Tq,S)
    bias = jnp.broadcast_to(bias[:, None, :, :], (Bt, H, Tq, S))
    bias = bias.reshape(Bt * H, Tq, S)

    # ---- Attention scores: contract head_dim of both operands (no explicit .T).
    s = jnp.einsum('bqd,bkd->bqk', Qh, Kh,
                   preferred_element_type=jnp.float32) + bias                # f32

    # ---- Numerically stable softmax in f32; approx reciprocal runs on the EUP.
    m = jnp.max(s, axis=-1, keepdims=True)
    p = jnp.exp(s - m)
    p = p * pl.reciprocal(jnp.sum(p, axis=-1, keepdims=True), approx=True)

    # TODO(synk): nn.Dropout(p=0.1) on attention probabilities is identity in eval
    # mode; training-mode dropout (pltpu.prng_*) is not implemented here.

    # ---- Weighted values and head merge back to (Bt*Tq, D).
    ctx = jnp.einsum('bqk,bkd->bqd', p.astype(cdt), Vh,
                     preferred_element_type=jnp.float32)                     # (Bt*H,Tq,hd)
    ctx = jnp.transpose(ctx.reshape(Bt, H, Tq, hd), (0, 2, 1, 3))
    ctx = ctx.reshape(Bt * Tq, D)

    # ---- Output projection W_o.
    out = jnp.dot(ctx.astype(cdt), wo_ref[...],
                  preferred_element_type=jnp.float32) + bo_ref[...]
    out_ref[...] = out.reshape(Bt, Tq, D).astype(out_ref.dtype)


def mha_forward(q, k, v, mask, params, num_heads,
                *, batch_block=8, q_block=128):
    """params: dict with 'wq','bq','wk','bk','wv','bv','wo','bo'.
    Weights are PyTorch-style (out, in); biases (D,). mask is (B, 1, S, S), 1 = keep."""
    B, S, D = q.shape
    head_dim = D // num_heads
    out_dtype = q.dtype
    cdt = jnp.bfloat16

    # Tile sizes: several batch rows per step; query tiles give a second parallel
    # grid axis (keeps both v7x TensorCores busy and bounds the score slab).
    Bt = _largest_divisor_leq(B, batch_block)
    tq = _largest_divisor_leq(S, q_block)

    # Glue: pre-transpose weights to (in, out) and cast MXU operands to bf16;
    # biases stay f32 (added to the f32 accumulator). Mask becomes int8.
    wq_t = params["wq"].T.astype(cdt)
    wk_t = params["wk"].T.astype(cdt)
    wv_t = params["wv"].T.astype(cdt)
    wo_t = params["wo"].T.astype(cdt)
    bq = params["bq"].reshape(1, D).astype(jnp.float32)
    bk = params["bk"].reshape(1, D).astype(jnp.float32)
    bv = params["bv"].reshape(1, D).astype(jnp.float32)
    bo = params["bo"].reshape(1, D).astype(jnp.float32)

    q_c = q.astype(cdt)
    k_c = k.astype(cdt)
    v_c = v.astype(cdt)
    mask_i8 = (mask.reshape(B, S, S) != 0).astype(jnp.int8)   # head-broadcast mask

    q_spec = pl.BlockSpec((Bt, tq, D), lambda b, s: (b, s, 0))
    kv_spec = pl.BlockSpec((Bt, S, D), lambda b, s: (b, 0, 0))
    mask_spec = pl.BlockSpec((Bt, tq, S), lambda b, s: (b, s, 0))
    w_spec = pl.BlockSpec((D, D), lambda b, s: (0, 0))
    b_spec = pl.BlockSpec((1, D), lambda b, s: (0, 0))
    out_spec = pl.BlockSpec((Bt, tq, D), lambda b, s: (b, s, 0))

    kernel = functools.partial(mha_kernel, num_heads=num_heads, head_dim=head_dim)

    return pl.pallas_call(
        kernel,
        out_shape=jax.ShapeDtypeStruct((B, S, D), out_dtype),
        grid_spec=pltpu.PrefetchScalarGridSpec(
            num_scalar_prefetch=0,
            grid=(B // Bt, S // tq),
            in_specs=[q_spec, kv_spec, kv_spec, mask_spec,
                      w_spec, b_spec, w_spec, b_spec,
                      w_spec, b_spec, w_spec, b_spec],
            out_specs=out_spec,
        ),
        compiler_params=pltpu.CompilerParams(
            dimension_semantics=("parallel", "parallel"),
            vmem_limit_bytes=32 * 1024 * 1024),
    )(q_c, k_c, v_c, mask_i8, wq_t, bq, wk_t, bk, wv_t, bv, wo_t, bo)


def mha_reference(q, k, v, mask, params, num_heads):
    """Pure-JAX f32 reference mirroring the PyTorch module (eval mode)."""
    B, S, D = q.shape
    hd = D // num_heads

    def lin(x, w, b):
        return x @ w.T + b

    Q = lin(q, params["wq"], params["bq"]).reshape(B, S, num_heads, hd).transpose(0, 2, 1, 3)
    K = lin(k, params["wk"], params["bk"]).reshape(B, S, num_heads, hd).transpose(0, 2, 1, 3)
    V = lin(v, params["wv"], params["bv"]).reshape(B, S, num_heads, hd).transpose(0, 2, 1, 3)

    scores = jnp.einsum("bhqd,bhkd->bhqk", Q, K) / jnp.sqrt(jnp.float32(hd))
    scores = jnp.where(mask == 0, -1e9, scores)
    probs = jax.nn.softmax(scores, axis=-1)
    x = jnp.einsum("bhqk,bhkd->bhqd", probs, V)
    x = x.transpose(0, 2, 1, 3).reshape(B, S, D)
    return lin(x, params["wo"], params["bo"])


if __name__ == "__main__":
    B, S, D, H = 2, 8, 32, 4

    key = jax.random.PRNGKey(0)
    keys = jax.random.split(key, 12)

    params = {
        "wq": 0.05 * jax.random.normal(keys[0], (D, D), jnp.float32),
        "bq": 0.01 * jax.random.normal(keys[1], (D,), jnp.float32),
        "wk": 0.05 * jax.random.normal(keys[2], (D, D), jnp.float32),
        "bk": 0.01 * jax.random.normal(keys[3], (D,), jnp.float32),
        "wv": 0.05 * jax.random.normal(keys[4], (D, D), jnp.float32),
        "bv": 0.01 * jax.random.normal(keys[5], (D,), jnp.float32),
        "wo": 0.05 * jax.random.normal(keys[6], (D, D), jnp.float32),
        "bo": 0.01 * jax.random.normal(keys[7], (D,), jnp.float32),
    }

    q = jax.random.normal(keys[8], (B, S, D), jnp.float32)
    k = jax.random.normal(keys[9], (B, S, D), jnp.float32)
    v = jax.random.normal(keys[10], (B, S, D), jnp.float32)
    # Causal mask broadcastable over heads: (B, 1, S, S), 1 = keep.
    tri = jnp.tril(jnp.ones((S, S), jnp.float32))
    mask = jnp.broadcast_to(tri, (B, 1, S, S))

    out = mha_forward(q, k, v, mask, params, H)
    out = jax.block_until_ready(out)

    ref = mha_reference(q, k, v, mask, params, H)
    assert out.shape == (B, S, D)
    # bf16 MXU operands + approx reciprocal -> compare at bf16-level tolerance.
    assert jnp.allclose(out, ref, atol=2e-2, rtol=2e-2), "mismatch vs reference"

    print("KERNEL_OK")
</pallas_src>

<mosaic_0001>
module attributes {stable_mosaic.version = 11 : i64} {
  func.func @mha_kernel(%arg0: i32, %arg1: i32, %arg2: memref<2x8x32xbf16, #tpu.memory_space<vmem>>, %arg3: memref<2x8x32xbf16, #tpu.memory_space<vmem>>, %arg4: memref<2x8x32xbf16, #tpu.memory_space<vmem>>, %arg5: memref<2x8x8xi8, #tpu.memory_space<vmem>>, %arg6: memref<32x32xbf16, #tpu.memory_space<vmem>>, %arg7: memref<1x32xf32, #tpu.memory_space<vmem>>, %arg8: memref<32x32xbf16, #tpu.memory_space<vmem>>, %arg9: memref<1x32xf32, #tpu.memory_space<vmem>>, %arg10: memref<32x32xbf16, #tpu.memory_space<vmem>>, %arg11: memref<1x32xf32, #tpu.memory_space<vmem>>, %arg12: memref<32x32xbf16, #tpu.memory_space<vmem>>, %arg13: memref<1x32xf32, #tpu.memory_space<vmem>>, %arg14: memref<2x8x32xf32, #tpu.memory_space<vmem>>) attributes {dimension_semantics = [#tpu.dimension_semantics<parallel>, #tpu.dimension_semantics<parallel>], iteration_bounds = array<i64: 1, 1>, scalar_prefetch = 0 : i64, scratch_operands = 0 : i64, tpu.core_type = #tpu.core_type<tc>, window_params = [{transform_indices = @transform_0, window_bounds = array<i64: 2, 8, 32>}, {transform_indices = @transform_1, window_bounds = array<i64: 2, 8, 32>}, {transform_indices = @transform_2, window_bounds = array<i64: 2, 8, 32>}, {transform_indices = @transform_3, window_bounds = array<i64: 2, 8, 8>}, {pipeline_mode = #tpu.pipeline_mode<synchronous>, transform_indices = @transform_4, window_bounds = array<i64: 32, 32>}, {pipeline_mode = #tpu.pipeline_mode<synchronous>, transform_indices = @transform_5, window_bounds = array<i64: 1, 32>}, {pipeline_mode = #tpu.pipeline_mode<synchronous>, transform_indices = @transform_6, window_bounds = array<i64: 32, 32>}, {pipeline_mode = #tpu.pipeline_mode<synchronous>, transform_indices = @transform_7, window_bounds = array<i64: 1, 32>}, {pipeline_mode = #tpu.pipeline_mode<synchronous>, transform_indices = @transform_8, window_bounds = array<i64: 32, 32>}, {pipeline_mode = #tpu.pipeline_mode<synchronous>, transform_indices = @transform_9, window_bounds = array<i64: 1, 32>}, {pipeline_mode = #tpu.pipeline_mode<synchronous>, transform_indices = @transform_10, window_bounds = array<i64: 32, 32>}, {pipeline_mode = #tpu.pipeline_mode<synchronous>, transform_indices = @transform_11, window_bounds = array<i64: 1, 32>}, {transform_indices = @transform_12, window_bounds = array<i64: 2, 8, 32>}]} {
    %c0 = arith.constant 0 : index
    %c0_0 = arith.constant 0 : index
    %c0_1 = arith.constant 0 : index
    %0 = vector.load %arg2[%c0, %c0_0, %c0_1] : memref<2x8x32xbf16, #tpu.memory_space<vmem>>, vector<2x8x32xbf16>
    %1 = vector.shape_cast %0 : vector<2x8x32xbf16> to vector<16x32xbf16>
    %c0_2 = arith.constant 0 : index
    %c0_3 = arith.constant 0 : index
    %c0_4 = arith.constant 0 : index
    %2 = vector.load %arg3[%c0_2, %c0_3, %c0_4] : memref<2x8x32xbf16, #tpu.memory_space<vmem>>, vector<2x8x32xbf16>
    %3 = vector.shape_cast %2 : vector<2x8x32xbf16> to vector<16x32xbf16>
    %c0_5 = arith.constant 0 : index
    %c0_6 = arith.constant 0 : index
    %c0_7 = arith.constant 0 : index
    %4 = vector.load %arg4[%c0_5, %c0_6, %c0_7] : memref<2x8x32xbf16, #tpu.memory_space<vmem>>, vector<2x8x32xbf16>
    %5 = vector.shape_cast %4 : vector<2x8x32xbf16> to vector<16x32xbf16>
    %c0_8 = arith.constant 0 : index
    %c0_9 = arith.constant 0 : index
    %6 = vector.load %arg6[%c0_8, %c0_9] : memref<32x32xbf16, #tpu.memory_space<vmem>>, vector<32x32xbf16>
    %cst = arith.constant dense<0.000000e+00> : vector<16x32xf32>
    %7 = tpu.matmul %1, %6, %cst {dimension_numbers = #tpu.dot_dimension_numbers<[1], [0], [0], [1], [0, 0, 1, 1], [], []>} : vector<16x32xbf16>, vector<32x32xbf16>, vector<16x32xf32> -> vector<16x32xf32>
    %c0_10 = arith.constant 0 : index
    %c0_11 = arith.constant 0 : index
    %8 = vector.load %arg7[%c0_10, %c0_11] : memref<1x32xf32, #tpu.memory_space<vmem>>, vector<1x32xf32>
    %9 = vector.broadcast %8 : vector<1x32xf32> to vector<16x32xf32>
    %10 = arith.addf %7, %9 : vector<16x32xf32>
    %c0_12 = arith.constant 0 : index
    %c0_13 = arith.constant 0 : index
    %11 = vector.load %arg8[%c0_12, %c0_13] : memref<32x32xbf16, #tpu.memory_space<vmem>>, vector<32x32xbf16>
    %cst_14 = arith.constant dense<0.000000e+00> : vector<16x32xf32>
    %12 = tpu.matmul %3, %11, %cst_14 {dimension_numbers = #tpu.dot_dimension_numbers<[1], [0], [0], [1], [0, 0, 1, 1], [], []>} : vector<16x32xbf16>, vector<32x32xbf16>, vector<16x32xf32> -> vector<16x32xf32>
    %c0_15 = arith.constant 0 : index
    %c0_16 = arith.constant 0 : index
    %13 = vector.load %arg9[%c0_15, %c0_16] : memref<1x32xf32, #tpu.memory_space<vmem>>, vector<1x32xf32>
    %14 = vector.broadcast %13 : vector<1x32xf32> to vector<16x32xf32>
    %15 = arith.addf %12, %14 : vector<16x32xf32>
    %c0_17 = arith.constant 0 : index
    %c0_18 = arith.constant 0 : index
    %16 = vector.load %arg10[%c0_17, %c0_18] : memref<32x32xbf16, #tpu.memory_space<vmem>>, vector<32x32xbf16>
    %cst_19 = arith.constant dense<0.000000e+00> : vector<16x32xf32>
    %17 = tpu.matmul %5, %16, %cst_19 {dimension_numbers = #tpu.dot_dimension_numbers<[1], [0], [0], [1], [0, 0, 1, 1], [], []>} : vector<16x32xbf16>, vector<32x32xbf16>, vector<16x32xf32> -> vector<16x32xf32>
    %c0_20 = arith.constant 0 : index
    %c0_21 = arith.constant 0 : index
    %18 = vector.load %arg11[%c0_20, %c0_21] : memref<1x32xf32, #tpu.memory_space<vmem>>, vector<1x32xf32>
    %19 = vector.broadcast %18 : vector<1x32xf32> to vector<16x32xf32>
    %20 = arith.addf %17, %19 : vector<16x32xf32>
    %cst_22 = arith.constant 8.000000e+00 : f32
    %21 = math.sqrt %cst_22 : f32
    %cst_23 = arith.constant 1.000000e+00 : f32
    %22 = arith.divf %cst_23, %21 : f32
    %23 = vector.broadcast %22 : f32 to vector<16x32xf32>
    %24 = arith.mulf %10, %23 : vector<16x32xf32>
    %25 = vector.shape_cast %24 : vector<16x32xf32> to vector<2x8x4x8xf32>
    %26 = tpu.transpose %25, [0, 2, 1, 3] : vector<2x8x4x8xf32> -> vector<2x4x8x8xf32>
    %27 = vector.shape_cast %26 : vector<2x4x8x8xf32> to vector<8x8x8xf32>
    %28 = arith.truncf %27 : vector<8x8x8xf32> to vector<8x8x8xbf16>
    %29 = vector.shape_cast %15 : vector<16x32xf32> to vector<2x8x4x8xf32>
    %30 = tpu.transpose %29, [0, 2, 1, 3] : vector<2x8x4x8xf32> -> vector<2x4x8x8xf32>
    %31 = vector.shape_cast %30 : vector<2x4x8x8xf32> to vector<8x8x8xf32>
    %32 = arith.truncf %31 : vector<8x8x8xf32> to vector<8x8x8xbf16>
    %33 = vector.shape_cast %20 : vector<16x32xf32> to vector<2x8x4x8xf32>
    %34 = tpu.transpose %33, [0, 2, 1, 3] : vector<2x8x4x8xf32> -> vector<2x4x8x8xf32>
    %35 = vector.shape_cast %34 : vector<2x4x8x8xf32> to vector<8x8x8xf32>
    %36 = arith.truncf %35 : vector<8x8x8xf32> to vector<8x8x8xbf16>
    %c0_24 = arith.constant 0 : index
    %c0_25 = arith.constant 0 : index
    %c0_26 = arith.constant 0 : index
    %37 = vector.load %arg5[%c0_24, %c0_25, %c0_26] : memref<2x8x8xi8, #tpu.memory_space<vmem>>, vector<2x8x8xi8>
    %38 = arith.sitofp %37 : vector<2x8x8xi8> to vector<2x8x8xf32>
    %cst_27 = arith.constant 1.000000e+00 : f32
    %39 = vector.broadcast %cst_27 : f32 to vector<2x8x8xf32>
    %40 = arith.subf %38, %39 : vector<2x8x8xf32>
    %cst_28 = arith.constant 1.000000e+09 : f32
    %41 = vector.broadcast %cst_28 : f32 to vector<2x8x8xf32>
    %42 = arith.mulf %40, %41 : vector<2x8x8xf32>
    %43 = vector.shape_cast %42 : vector<2x8x8xf32> to vector<2x1x8x8xf32>
    %44 = vector.shape_cast %43 : vector<2x1x8x8xf32> to vector<2x1x8x8xf32>
    %45 = vector.broadcast %44 : vector<2x1x8x8xf32> to vector<2x4x8x8xf32>
    %46 = vector.shape_cast %45 : vector<2x4x8x8xf32> to vector<8x8x8xf32>
    "tpu.trace_start"() <{level = 10 : i32, message = "bqd,bkd->bqk"}> : () -> ()
    %cst_29 = arith.constant dense<0.000000e+00> : vector<8x8x8xf32>
    %47 = tpu.matmul %28, %32, %cst_29 {dimension_numbers = #tpu.dot_dimension_numbers<[2], [2], [1], [1], [0, 0, 0, 1, 1, 1], [0], [0]>} : vector<8x8x8xbf16>, vector<8x8x8xbf16>, vector<8x8x8xf32> -> vector<8x8x8xf32>
    "tpu.trace_stop"() : () -> ()
    %48 = arith.addf %47, %46 : vector<8x8x8xf32>
    %cst_30 = arith.constant dense<0xFF800000> : vector<8x8xf32>
    %49 = vector.multi_reduction <maximumf>, %48, %cst_30 [2] : vector<8x8x8xf32> to vector<8x8xf32>
    %50 = vector.shape_cast %49 : vector<8x8xf32> to vector<8x8x1xf32>
    %51 = vector.broadcast %50 : vector<8x8x1xf32> to vector<8x8x8xf32>
    %52 = arith.subf %48, %51 : vector<8x8x8xf32>
    %53 = math.exp %52 : vector<8x8x8xf32>
    %cst_31 = arith.constant dense<0.000000e+00> : vector<8x8xf32>
    %54 = vector.multi_reduction <add>, %53, %cst_31 [2] : vector<8x8x8xf32> to vector<8x8xf32>
    %55 = vector.shape_cast %54 : vector<8x8xf32> to vector<8x8x1xf32>
    %56 = tpu.reciprocal %55 {approx = true} : vector<8x8x1xf32> -> vector<8x8x1xf32>
    %57 = vector.broadcast %56 : vector<8x8x1xf32> to vector<8x8x8xf32>
    %58 = arith.mulf %53, %57 : vector<8x8x8xf32>
    %59 = arith.truncf %58 : vector<8x8x8xf32> to vector<8x8x8xbf16>
    "tpu.trace_start"() <{level = 10 : i32, message = "bqk,bkd->bqd"}> : () -> ()
    %cst_32 = arith.constant dense<0.000000e+00> : vector<8x8x8xf32>
    %60 = tpu.matmul %59, %36, %cst_32 {dimension_numbers = #tpu.dot_dimension_numbers<[2], [1], [1], [2], [0, 0, 0, 1, 1, 2], [0], [0]>} : vector<8x8x8xbf16>, vector<8x8x8xbf16>, vector<8x8x8xf32> -> vector<8x8x8xf32>
    "tpu.trace_stop"() : () -> ()
    %61 = vector.shape_cast %60 : vector<8x8x8xf32> to vector<2x4x8x8xf32>
    %62 = tpu.transpose %61, [0, 2, 1, 3] : vector<2x4x8x8xf32> -> vector<2x8x4x8xf32>
    %63 = vector.shape_cast %62 : vector<2x8x4x8xf32> to vector<16x32xf32>
    %64 = arith.truncf %63 : vector<16x32xf32> to vector<16x32xbf16>
    %c0_33 = arith.constant 0 : index
    %c0_34 = arith.constant 0 : index
    %65 = vector.load %arg12[%c0_33, %c0_34] : memref<32x32xbf16, #tpu.memory_space<vmem>>, vector<32x32xbf16>
    %cst_35 = arith.constant dense<0.000000e+00> : vector<16x32xf32>
    %66 = tpu.matmul %64, %65, %cst_35 {dimension_numbers = #tpu.dot_dimension_numbers<[1], [0], [0], [1], [0, 0, 1, 1], [], []>} : vector<16x32xbf16>, vector<32x32xbf16>, vector<16x32xf32> -> vector<16x32xf32>
    %c0_36 = arith.constant 0 : index
    %c0_37 = arith.constant 0 : index
    %67 = vector.load %arg13[%c0_36, %c0_37] : memref<1x32xf32, #tpu.memory_space<vmem>>, vector<1x32xf32>
    %68 = vector.broadcast %67 : vector<1x32xf32> to vector<16x32xf32>
    %69 = arith.addf %66, %68 : vector<16x32xf32>
    %70 = vector.shape_cast %69 : vector<16x32xf32> to vector<2x8x32xf32>
    %c0_38 = arith.constant 0 : index
    %c0_39 = arith.constant 0 : index
    %c0_40 = arith.constant 0 : index
    %71 = vector.load %arg14[%c0_38, %c0_39, %c0_40] : memref<2x8x32xf32, #tpu.memory_space<vmem>>, vector<2x8x32xf32>
    tpu.vector_store %arg14[%c0_38, %c0_39, %c0_40], %70 {strides = array<i32>} : memref<2x8x32xf32, #tpu.memory_space<vmem>>, vector<2x8x32xf32>,
    return
  }
  func.func @transform_0(%arg0: i32, %arg1: i32) -> (i32, i32, i32) {
    %c0_i32 = arith.constant 0 : i32
    %c0_i32_0 = arith.constant 0 : i32
    return %arg0, %arg1, %c0_i32 : i32, i32, i32
  }
  func.func @transform_1(%arg0: i32, %arg1: i32) -> (i32, i32, i32) {
    %c0_i32 = arith.constant 0 : i32
    %c0_i32_0 = arith.constant 0 : i32
    %c0_i32_1 = arith.constant 0 : i32
    return %arg0, %c0_i32, %c0_i32_0 : i32, i32, i32
  }
  func.func @transform_2(%arg0: i32, %arg1: i32) -> (i32, i32, i32) {
    %c0_i32 = arith.constant 0 : i32
    %c0_i32_0 = arith.constant 0 : i32
    %c0_i32_1 = arith.constant 0 : i32
    return %arg0, %c0_i32, %c0_i32_0 : i32, i32, i32
  }
  func.func @transform_3(%arg0: i32, %arg1: i32) -> (i32, i32, i32) {
    %c0_i32 = arith.constant 0 : i32
    %c0_i32_0 = arith.constant 0 : i32
    return %arg0, %arg1, %c0_i32 : i32, i32, i32
  }
  func.func @transform_4(%arg0: i32, %arg1: i32) -> (i32, i32) {
    %c0_i32 = arith.constant 0 : i32
    %c0_i32_0 = arith.constant 0 : i32
    %c0_i32_1 = arith.constant 0 : i32
    return %c0_i32, %c0_i32_0 : i32, i32
  }
  func.func @transform_5(%arg0: i32, %arg1: i32) -> (i32, i32) {
    %c0_i32 = arith.constant 0 : i32
    %c0_i32_0 = arith.constant 0 : i32
    %c0_i32_1 = arith.constant 0 : i32
    return %c0_i32, %c0_i32_0 : i32, i32
  }
  func.func @transform_6(%arg0: i32, %arg1: i32) -> (i32, i32) {
    %c0_i32 = arith.constant 0 : i32
    %c0_i32_0 = arith.constant 0 : i32
    %c0_i32_1 = arith.constant 0 : i32
    return %c0_i32, %c0_i32_0 : i32, i32
  }
  func.func @transform_7(%arg0: i32, %arg1: i32) -> (i32, i32) {
    %c0_i32 = arith.constant 0 : i32
    %c0_i32_0 = arith.constant 0 : i32
    %c0_i32_1 = arith.constant 0 : i32
    return %c0_i32, %c0_i32_0 : i32, i32
  }
  func.func @transform_8(%arg0: i32, %arg1: i32) -> (i32, i32) {
    %c0_i32 = arith.constant 0 : i32
    %c0_i32_0 = arith.constant 0 : i32
    %c0_i32_1 = arith.constant 0 : i32
    return %c0_i32, %c0_i32_0 : i32, i32
  }
  func.func @transform_9(%arg0: i32, %arg1: i32) -> (i32, i32) {
    %c0_i32 = arith.constant 0 : i32
    %c0_i32_0 = arith.constant 0 : i32
    %c0_i32_1 = arith.constant 0 : i32
    return %c0_i32, %c0_i32_0 : i32, i32
  }
  func.func @transform_10(%arg0: i32, %arg1: i32) -> (i32, i32) {
    %c0_i32 = arith.constant 0 : i32
    %c0_i32_0 = arith.constant 0 : i32
    %c0_i32_1 = arith.constant 0 : i32
    return %c0_i32, %c0_i32_0 : i32, i32
  }
  func.func @transform_11(%arg0: i32, %arg1: i32) -> (i32, i32) {
    %c0_i32 = arith.constant 0 : i32
    %c0_i32_0 = arith.constant 0 : i32
    %c0_i32_1 = arith.constant 0 : i32
    return %c0_i32, %c0_i32_0 : i32, i32
  }
  func.func @transform_12(%arg0: i32, %arg1: i32) -> (i32, i32, i32) {
    %c0_i32 = arith.constant 0 : i32
    %c0_i32_0 = arith.constant 0 : i32
    return %arg0, %arg1, %c0_i32 : i32, i32, i32
  }
}

</mosaic_0001>

<bundles_post_ra>
// kernel: tpu_custom_call.1
= control target key start
LH: loop header
LB: loop body
LE: loop exit
PB: predicated region body
PF: predicated region fallthrough
CT: control target
= control target key end

     0   :  { %17 = vsyncpa [#allocation3], 0  ;;  %s3636_s0 = inlined_call_operand.hbm [shape: bf16[2,8,32], index: 0, kind: input, shape index: {}]   ;;  %s3637_s1 = inlined_call_operand.hbm [shape: bf16[2,8,32], index: 1, kind: input, shape index: {}]   ;;  %s3638_s2 = inlined_call_operand.hbm [shape: bf16[2,8,32], index: 2, kind: input, shape index: {}]   ;;  %s3639_s3 = inlined_call_operand.hbm [shape: s8[2,8,8], index: 3, kind: input, shape index: {}]   ;;  %s3640_s4 = inlined_call_operand.hbm [shape: bf16[32,32], index: 4, kind: input, shape index: {}]   ;;  %s3641_s5 = inlined_call_operand.vmem [shape: f32[1,32], index: 5, kind: input, shape index: {}]   ;;  %s3642_s6 = inlined_call_operand.vmem [shape: bf16[32,32], index: 6, kind: input, shape index: {}]   ;;  %s3643_s7 = inlined_call_operand.vmem [shape: f32[1,32], index: 7, kind: input, shape index: {}]   ;;  %s3644_s8 = inlined_call_operand.hbm [shape: bf16[32,32], index: 8, kind: input, shape index: {}]   ;;  %s3645_s9 = inlined_call_operand.hbm [shape: f32[1,32], index: 9, kind: input, shape index: {}]   ;;  %s3646_s10 = inlined_call_operand.vmem [shape: bf16[32,32], index: 10, kind: input, shape index: {}]   ;;  %s3647_s11 = inlined_call_operand.vmem [shape: f32[1,32], index: 11, kind: input, shape index: {}]   ;;  %s3648_s12 = inlined_call_operand.hbm [shape: f32[2,8,32], index: 12, kind: output, shape index: {}]  }
   0x1   :  { %18 = vsyncpa [#allocation6], 0 }
   0x2   :  { %19 = vsyncpa [#allocation9], 0 }
   0x3   :  { %20 = vsyncpa [#allocation12], 0 }
   0x4   :  { %21 = vsyncpa [#allocation4], 0  ;;  %s2995_s21 = smov [#allocation5]   ;;  %s2996_s23 = smov [#allocation8]  }
   0x5   :  { %s39_s22 = sshll.u32 %s2995_s21, 4  ;;  %s63_s24 = sshll.u32 %s2996_s23, 4  ;;  %s40_s22 = int_to_ptr.vmem [resolvable:$true] %s39_s22  ;;  %s3083_s24 = int_to_ptr.vmem [resolvable:$true] %s63_s24 }
   0x6   :  { %s2809_s27 = scalar_lea.hbm %s3637_s1, 128 }
   0x7   :  { %p2810_p0 = scmp.ne.s32.totalorder %s3637_s1, %s2809_s27  ;;  %p2813_p1 = scmp.lt.u32.totalorder %s2809_s27, %s3637_s1 }
   0x9   :  { %p2815_p2 = pnand %p2813_p1, %p2810_p0 }
   0xb   :  { %2818 = shalt.err (!%p2815_p2)
}
   0xc   :  { %s2819_s14 = scalar_lea.vmem %s40_s22, 128  ;;  %p2824_p4 = scmp.lt.s32.totalorder %s40_s22, %s40_s22 }
   0xd   :  { %p2820_p3 = scmp.ne.s32.totalorder %s40_s22, %s2819_s14  ;;  %p2825_p5 = scmp.lt.s32.totalorder %s2819_s14, %s2819_s14 }
   0xf   :  { %p2826_p6 = por %p2825_p5, %p2824_p4 }
  0x11   :  { %p2827_p7 = pnand %p2826_p6, %p2820_p3 }
  0x13   :  { %2830 = shalt.err (!%p2827_p7)
}
  0x14   :  { %s2997_s15 = smov 64   ;;  %s2998_s16 = smov 4  }
  0x15   :  { %45 = dma.hbm_to_vmem [thread:$0]  %s3637_s1, 128, %s40_s22, [#allocation6], %s2997_s15, %s2997_s15, %s2998_s16  }
  0x16   :  { %s2831_s21 = scalar_lea.hbm %s3639_s3, 64 }
  0x17   :  { %p2832_p8 = scmp.ne.s32.totalorder %s3639_s3, %s2831_s21  ;;  %p2835_p9 = scmp.lt.u32.totalorder %s2831_s21, %s3639_s3 }
  0x19   :  { %p2837_p10 = pnand %p2835_p9, %p2832_p8 }
  0x1b   :  { %2840 = shalt.err (!%p2837_p10)
}
  0x1c   :  { %s2841_s28 = scalar_lea.vmem %s3083_s24, 64  ;;  %p2846_p12 = scmp.lt.s32.totalorder %s3083_s24, %s3083_s24 }
  0x1d   :  { %p2842_p11 = scmp.ne.s32.totalorder %s3083_s24, %s2841_s28  ;;  %p2847_p13 = scmp.lt.s32.totalorder %s2841_s28, %s2841_s28 }
  0x1f   :  { %p2848_p0 = por %p2847_p13, %p2846_p12 }
  0x21   :  { %p2849_p1 = pnand %p2848_p0, %p2842_p11 }
  0x23   :  { %2852 = shalt.err (!%p2849_p1)
}
  0x24   :  { %s2999_s1 = smov 32   ;;  %s3000_s22 = smov 2  }
  0x25   :  { %69 = dma.hbm_to_vmem [thread:$0]  %s3639_s3, 64, %s3083_s24, [#allocation9], %s2999_s1, %s2999_s1, %s3000_s22  }
  0x26   :  { %s3001_s13 = smov [#allocation11]   ;;  %s3002_s17 = smov [#allocation2]  }
  0x27   :  { %s93_s14 = sshll.u32 %s3001_s13, 4  ;;  %s27_s18 = sshll.u32 %s3002_s17, 4  ;;  %s94_s14 = int_to_ptr.vmem [resolvable:$true] %s93_s14  ;;  %s3117_s18 = int_to_ptr.vmem [resolvable:$true] %s27_s18 }
  0x28   :  { %s2853_s21 = scalar_lea.hbm %s3644_s8, 256 }
  0x29   :  { %p2854_p2 = scmp.ne.s32.totalorder %s3644_s8, %s2853_s21  ;;  %p2857_p3 = scmp.lt.u32.totalorder %s2853_s21, %s3644_s8 }
  0x2b   :  { %p2859_p4 = pnand %p2857_p3, %p2854_p2 }
  0x2d   :  { %2862 = shalt.err (!%p2859_p4)
}
  0x2e   :  { %s2863_s3 = scalar_lea.vmem %s94_s14, 256  ;;  %p2868_p6 = scmp.lt.s32.totalorder %s94_s14, %s94_s14 }
  0x2f   :  { %p2864_p5 = scmp.ne.s32.totalorder %s94_s14, %s2863_s3  ;;  %p2869_p7 = scmp.lt.s32.totalorder %s2863_s3, %s2863_s3 }
  0x31   :  { %p2870_p8 = por %p2869_p7, %p2868_p6 }
  0x33   :  { %p2871_p9 = pnand %p2870_p8, %p2864_p5 }
  0x35   :  { %2874 = shalt.err (!%p2871_p9)
}
  0x36   :  { %99 = dma.hbm_to_vmem [thread:$0]  %s3644_s8, 256, %s94_s14, [#allocation12], %s2997_s15, %s2997_s15, %s2998_s16  }
  0x37   :  { %s2875_s29 = scalar_lea.hbm %s3636_s0, 128 }
  0x38   :  { %p2876_p10 = scmp.ne.s32.totalorder %s3636_s0, %s2875_s29  ;;  %p2879_p11 = scmp.lt.u32.totalorder %s2875_s29, %s3636_s0 }
  0x3a   :  { %p2881_p12 = pnand %p2879_p11, %p2876_p10 }
  0x3c   :  { %2884 = shalt.err (!%p2881_p12)
}
  0x3d   :  { %s2885_s20 = scalar_lea.vmem %s3117_s18, 128  ;;  %p2890_p0 = scmp.lt.s32.totalorder %s3117_s18, %s3117_s18 }
  0x3e   :  { %p2886_p13 = scmp.ne.s32.totalorder %s3117_s18, %s2885_s20  ;;  %p2891_p1 = scmp.lt.s32.totalorder %s2885_s20, %s2885_s20 }
  0x40   :  { %p2892_p2 = por %p2891_p1, %p2890_p0 }
  0x42   :  { %p2893_p3 = pnand %p2892_p2, %p2886_p13 }
  0x44   :  { %2896 = shalt.err (!%p2893_p3)
}
  0x45   :  { %33 = dma.hbm_to_vmem [thread:$0]  %s3636_s0, 128, %s3117_s18, [#allocation3], %s2997_s15, %s2997_s15, %s2998_s16  }
  0x46   :  { %s3003_s21 = smov [#allocation7]   ;;  %s3004_s25 = smov [#allocation10]  }
  0x47   :  { %s51_s23 = sshll.u32 %s3003_s21, 4  ;;  %s75_s26 = sshll.u32 %s3004_s25, 4  ;;  %s52_s23 = int_to_ptr.vmem [resolvable:$true] %s51_s23  ;;  %s3154_s26 = int_to_ptr.vmem [resolvable:$true] %s75_s26 }
  0x48   :  { %s2897_s24 = scalar_lea.hbm %s3638_s2, 128 }
  0x49   :  { %p2898_p4 = scmp.ne.s32.totalorder %s3638_s2, %s2897_s24  ;;  %p2901_p5 = scmp.lt.u32.totalorder %s2897_s24, %s3638_s2 }
  0x4b   :  { %p2903_p6 = pnand %p2901_p5, %p2898_p4 }
  0x4d   :  { %2906 = shalt.err (!%p2903_p6)
}
  0x4e   :  { %s2907_s0 = scalar_lea.vmem %s52_s23, 128  ;;  %p2912_p8 = scmp.lt.s32.totalorder %s52_s23, %s52_s23 }
  0x4f   :  { %p2908_p7 = scmp.ne.s32.totalorder %s52_s23, %s2907_s0  ;;  %p2913_p9 = scmp.lt.s32.totalorder %s2907_s0, %s2907_s0 }
  0x51   :  { %p2914_p10 = por %p2913_p9, %p2912_p8 }
  0x53   :  { %p2915_p11 = pnand %p2914_p10, %p2908_p7 }
  0x55   :  { %2918 = shalt.err (!%p2915_p11)
}
  0x56   :  { %57 = dma.hbm_to_vmem [thread:$0]  %s3638_s2, 128, %s52_s23, [#allocation6], %s2997_s15, %s2997_s15, %s2998_s16  }
  0x57   :  { %s2919_s19 = scalar_lea.hbm %s3640_s4, 256 }
  0x58   :  { %p2920_p12 = scmp.ne.s32.totalorder %s3640_s4, %s2919_s19  ;;  %p2923_p13 = scmp.lt.u32.totalorder %s2919_s19, %s3640_s4 }
  0x5a   :  { %p2925_p0 = pnand %p2923_p13, %p2920_p12 }
  0x5c   :  { %2928 = shalt.err (!%p2925_p0)
}
  0x5d   :  { %s2929_s25 = scalar_lea.vmem %s3154_s26, 256  ;;  %p2934_p2 = scmp.lt.s32.totalorder %s3154_s26, %s3154_s26 }
  0x5e   :  { %p2930_p1 = scmp.ne.s32.totalorder %s3154_s26, %s2929_s25  ;;  %p2935_p3 = scmp.lt.s32.totalorder %s2929_s25, %s2929_s25 }
  0x60   :  { %p2936_p4 = por %p2935_p3, %p2934_p2 }
  0x62   :  { %p2937_p5 = pnand %p2936_p4, %p2930_p1 }
  0x64   :  { %2940 = shalt.err (!%p2937_p5)
}
  0x65   :  { %81 = dma.hbm_to_vmem [thread:$0]  %s3640_s4, 256, %s3154_s26, [#allocation9], %s2997_s15, %s2997_s15, %s2998_s16  }
  0x66   :  { %s3005_s27 = smov [#allocation13]   ;;  %s2941_s1 = scalar_lea.hbm %s3645_s9, 16 }
  0x67   :  { %s106_s3 = sshll.u32 %s3005_s27, 4  ;;  %p2942_p6 = scmp.ne.s32.totalorder %s3645_s9, %s2941_s1  ;;  %s107_s3 = int_to_ptr.vmem [resolvable:$true] %s106_s3 }
  0x68   :  { %p2945_p7 = scmp.lt.u32.totalorder %s2941_s1, %s3645_s9 }
  0x6a   :  { %p2947_p8 = pnand %p2945_p7, %p2942_p6 }
  0x6c   :  { %2950 = shalt.err (!%p2947_p8)
}
  0x6d   :  { %s2951_s30 = scalar_lea.vmem %s107_s3, 16  ;;  %s2955_s4 = scalar_lea.vmem %s107_s3, 32 }
  0x6e   :  { %p2952_p9 = scmp.ne.s32.totalorder %s107_s3, %s2951_s30  ;;  %p2956_p10 = scmp.lt.s32.totalorder %s107_s3, %s107_s3 }
  0x6f   :  { %p2957_p11 = scmp.lt.s32.totalorder %s2955_s4, %s2951_s30 }
  0x71   :  { %p2958_p12 = por %p2957_p11, %p2956_p10 }
  0x73   :  { %p2959_p13 = pnand %p2958_p12, %p2952_p9 }
  0x75   :  { %2962 = shalt.err (!%p2959_p13)
}
  0x76   :  { %109 = dma.hbm_to_vmem [thread:$0]  %s3645_s9, 16, %s107_s3, [#allocation12]  }
  0x77   :  { %2985 = dma.done.wait [#allocation3], 128  }
  0x78   :  { %2986 = vsyncadd [#allocation3], 4294967168 }
  0x79   :  { %2987 = dma.done.wait [#allocation6], 256  }
  0x7a   :  { %2988 = vsyncadd [#allocation6], 4294967040 }
  0x7b   :  { %2989 = dma.done.wait [#allocation9], 320  }
  0x7c   :  { %2990 = vsyncadd [#allocation9], 4294966976 }
  0x7d   :  { %2991 = dma.done.wait [#allocation12], 272  }
  0x7e   :  { %2992 = vsyncadd [#allocation12], 4294967024  ;;  %v3006_v0 = vmov 0.0   ;;  %vm3007_vm0 = vmmov 0   ;;  %v2766_v1 = vld [vmem:[%s3642_s6] sm:$0xff]   ;;  %v2768_v3 = vld [vmem:[%s3642_s6 + $0x8] sm:$0xff]   ;;  %v386_v28 = vlaneseq }
  0x7f   :  { %2608 = vmatprep.subr.bf16.mxu1 %v3006_v0  ;;  %2600 = vmatprep.subr.bf16.mxu0 %v3006_v0  ;;  %v2767_v2 = vld [vmem:[#allocation10] sm:$0xff]   ;;  %v2769_v4 = vld [vmem:[#allocation10 + $0x8] sm:$0xff]   ;;  %vm170_vm1 = vcmask 261120   ;;  %v2772_v7 = vld [vmem:[#allocation11] sm:$0xff]   ;;  %s3008_s14 = smov 104   ;;  %s3009_s21 = smov 120  }
  0x80   :  { %2612 = vmatprep.mubr.msk.bf16.mxu1 %vm3007_vm0, %v3006_v0  ;;  %2604 = vmatprep.mubr.msk.bf16.mxu0 %vm3007_vm0, %v3006_v0  ;;  %v2770_v5 = vld [vmem:[#allocation5] sm:$0xff]   ;;  %v2771_v6 = vld [vmem:[#allocation2] sm:$0xff]   ;;  %v2773_v8 = vld [vmem:[#allocation11 + $0x8] sm:$0xff]   ;;  %v3011_v26 = vmov 1983009808   ;;  %v387_v34 = vshrl.u32 %v386_v28, 7 }
  0x81   :  { %2609 = vmatpush3.bf16.msra.mxu1 %v2766_v1  ;;  %2601 = vmatpush3.bf16.msra.mxu0 %v2767_v2  ;;  %v2774_v9 = vld [vmem:[#allocation7] sm:$0xff]   ;;  %v2504_v10 = vld [vmem:[%s3643_s7] ss:$0 sm:$0xff]  ;;  %s3010_s7 = smov 112   ;;  %v384_v27 = vunpack.c.l.s4 %v3011_v26  ;;  %v2509_v29 = vld [vmem:[#allocation13] ss:$0 sm:$0xff] }
  0x82   :  { %2610 = vmatprep.subr.bf16.mxu1 %v3006_v0  ;;  %2602 = vmatprep.subr.bf16.mxu0 %v3006_v0  ;;  %v2499_v11 = vld [vmem:[%s3641_s5] ss:$0 sm:$0xff]  ;;  %v3012_v30 = vmov 1934713408   ;;  %vm1271_vm2 = vcmask 64512   ;;  %vm1739_vm3 = vcmask 1043456  }
  0x83   :  { %v416_v31 = vunpack.c.l.s4 %v3012_v30  ;;  %v385_v33 = vunpack.c.0.s8 %v384_v27  ;;  %s3013_s27 = smov 16   ;;  %s3014_s3 = smov 8   ;;  %vm2403_vm4 = vcmask 130048   ;;  %vm2406_vm5 = vcmask 195584  }
  0x84   :  { %s3015_s24 = smov 24   ;;  %s3016_s1 = smov [#allocation14]  }
  0x85   :  { %2611 = vmatpush3.bf16.msra.mxu1 %v2768_v3  ;;  %2603 = vmatpush3.bf16.msra.mxu0 %v2769_v4  ;;  %v417_v40 = vunpack.c.0.s8 %v416_v31  ;;  %v3264_v43 = vsub.s32 %v385_v33, %v387_v34  ;;  %s2484_s22 = sshll.u32 %s3016_s1, 4  ;;  %s2485_s22 = int_to_ptr.vmem [resolvable:$true] %s2484_s22 }
  0x86   :  { %2624 = vmatprep.subr.bf16.mxu1 %v3006_v0  ;;  %2616 = vmatprep.subr.bf16.mxu0 %v3006_v0  ;;  %s2963_s29 = scalar_lea.vmem %s2485_s22, 256  ;;  %p2968_p1 = scmp.lt.s32.totalorder %s2485_s22, %s2485_s22 }
  0x87   :  { %v3266_v50 = vsub.s32 %v417_v40, %v387_v34  ;;  %p2964_p0 = scmp.ne.s32.totalorder %s2485_s22, %s2963_s29  ;;  %p2969_p2 = scmp.lt.s32.totalorder %s2963_s29, %s2963_s29 }
  0x88   :  { %2613 = vmatmul.mubr.msk.bf16.vlgmr.msra.gmra.mrb[0].mxu1 %vm170_vm1, %v2770_v5  ;;  %2605 = vmatmul.mubr.msk.bf16.vlgmr.msra.gmra.mrb[0].mxu0 %vm170_vm1, %v2771_v6 }
  0x89   :  { %2626 = vmatprep.mubr.msk.bf16.mxu1 %vm3007_vm0, %v3006_v0  ;;  %2620 = vmatprep.mubr.msk.bf16.mxu0 %vm3007_vm0, %v3006_v0  ;;  %p2970_p3 = por %p2969_p2, %p2968_p1 }
  0x8a   :  { %2617 = vmatpush3.bf16.msra.mxu0 %v2772_v7 }
  0x8b   :  { %2618 = vmatprep.subr.bf16.mxu0 %v3006_v0  ;;  %p2971_p4 = pnand %p2970_p3, %p2964_p0 }
  0x8e   :  { %2619 = vmatpush3.bf16.msra.mxu0 %v2773_v8 }
  0x8f   :  { %2630 = vmatprep.subr.bf16.mxu0 %v3006_v0 }
  0x91   :  { %2621 = vmatmul.mubr.msk.bf16.vlgmr.msra.gmra.mrb[4].mxu0 %vm170_vm1, %v2774_v9 }
  0x92   :  { %2632 = vmatprep.mubr.msk.bf16.mxu0 %vm3007_vm0, %v3006_v0 }
 0x15b   :  { %v280_v12 = vpop.f32.mrb[0].mxu1  ;;  %v208_v15 = vpop.f32.mrb[0].mxu0 }
 0x15c   :  { %v281_v13 = vadd.f32 %v2504_v10, %v280_v12  ;;  %v2614_v14 = vpop.f32.mrb[1].mxu1  ;;  %v209_v16 = vadd.f32 %v2499_v11, %v208_v15  ;;  %v2606_v18 = vpop.f32.mrb[1].mxu0 }
 0x15d   :  { %v283_v17 = vpop.f32.mrb[2].mxu1  ;;  %v211_v20 = vpop.f32.mrb[2].mxu0 }
 0x15e   :  { %675 = vrot.lane.b32.xlu1 %v281_v13, %s3008_s14  ;;  %663 = vrot.lane.b32.xlu0 %v281_v13, %s3009_s21  ;;  %v2615_v19 = vpop.f32.mrb[3].mxu1  ;;  %v359_v21 = vmul.f32 0.35355338, %v209_v16  ;;  %v2607_v22 = vpop.f32.mrb[3].mxu0  ;;  %v3242_v23 = vadd.f32 %v2504_v10, %v283_v17  ;;  %v212_v24 = vadd.f32 %v2499_v11, %v211_v20 }
 0x160   :  { %v3248_v25 = vmul.f32 0.35355338, %v212_v24 }
 0x162   :  { %669 = vrot.lane.b32.xlu0 %v281_v13, %s3010_s7  ;;  %363 = vrot.lane.b32.xlu1 %v359_v21, %s3009_s21 }
 0x164   :  { %v352_v32 = vpop.f32.mrb[4].mxu0 }
 0x165   :  { %v3258_v35 = vadd.f32 %v2509_v29, %v352_v32  ;;  %v2622_v36 = vpop.f32.mrb[5].mxu0 }
 0x166   :  { %369 = vrot.lane.b32.xlu0 %v359_v21, %s3010_s7  ;;  %375 = vrot.lane.b32.xlu1 %v359_v21, %s3008_s14  ;;  %v355_v39 = vpop.f32.mrb[6].mxu0 }
 0x167   :  { %v3262_v41 = vadd.f32 %v2509_v29, %v355_v39  ;;  %v2623_v42 = vpop.f32.mrb[7].mxu0 }
 0x16a   :  { %665 = vrot.lane.b32.xlu0 %v3242_v23, %s3009_s21  ;;  %671 = vrot.lane.b32.xlu1 %v3242_v23, %s3010_s7 }
 0x16e   :  { %677 = vrot.lane.b32.xlu0 %v3242_v23, %s3008_s14  ;;  %365 = vrot.lane.b32.xlu1 %v3248_v25, %s3009_s21 }
 0x172   :  { %371 = vrot.lane.b32.xlu0 %v3248_v25, %s3010_s7  ;;  %377 = vrot.lane.b32.xlu1 %v3248_v25, %s3008_s14 }
 0x176   :  { %963 = vrot.lane.b32.xlu1 %v3258_v35, %s3009_s21 }
 0x1d0   :  { %v676_v37 = vpop.permute.xlu1 %675  ;;  %v664_v38 = vpop.permute.xlu0 %663 }
 0x1d1   :  { %v697_v44 = vcombine.low %v664_v38, %v676_v37  ;;  %v698_v45 = vcombine.high %v664_v38, %v676_v37 }
 0x1d3   :  { %v705_v51 = vrot.slane %v697_v44, %v3264_v43  ;;  %v712_v52 = vrot.slane %v698_v45, %v3264_v43 }
 0x1d4   :  { %v670_v46 = vpop.permute.xlu0 %669  ;;  %v364_v47 = vpop.permute.xlu1 %363 }
 0x1d5   :  { %v681_v48 = vcombine.low %v281_v13, %v670_v46  ;;  %v682_v49 = vcombine.high %v281_v13, %v670_v46 }
 0x1d7   :  { %v689_v53 = vrot.slane %v681_v48, %v3264_v43  ;;  %v696_v54 = vrot.slane %v682_v49, %v3264_v43 }
 0x1d8   :  { %v370_v55 = vpop.permute.xlu0 %369  ;;  %v376_v56 = vpop.permute.xlu1 %375 }
 0x1d9   :  { %v713_v57 = vcombine.low %v689_v53, %v705_v51  ;;  %v714_v58 = vcombine.high %v689_v53, %v705_v51  ;;  %v729_v59 = vcombine.low %v696_v54, %v712_v52  ;;  %v730_v60 = vcombine.high %v696_v54, %v712_v52 }
 0x1da   :  { %v381_v61 = vcombine.low %v359_v21, %v370_v55  ;;  %v382_v62 = vcombine.high %v359_v21, %v370_v55  ;;  %v397_v63 = vcombine.low %v364_v47, %v376_v56  ;;  %v398_v1 = vcombine.high %v364_v47, %v376_v56 }
 0x1db   :  { %v721_v2 = vrot.slane %v713_v57, %v3266_v50  ;;  %v728_v3 = vrot.slane %v714_v58, %v3266_v50  ;;  %v737_v4 = vrot.slane %v729_v59, %v3266_v50  ;;  %v744_v5 = vrot.slane %v730_v60, %v3266_v50 }
 0x1dc   :  { %v389_v6 = vrot.slane %v381_v61, %v3264_v43  ;;  %v396_v7 = vrot.slane %v382_v62, %v3264_v43  ;;  %v405_v8 = vrot.slane %v397_v63, %v3264_v43  ;;  %v412_v9 = vrot.slane %v398_v1, %v3264_v43  ;;  %v666_v10 = vpop.permute.xlu0 %665  ;;  %v672_v11 = vpop.permute.xlu1 %671 }
 0x1dd   :  { %v817_v16 = vcombine.low %v721_v2, %v728_v3  ;;  %v2518_v17 = vcombine.high %v721_v2, %v728_v3  ;;  %v833_v18 = vcombine.low %v737_v4, %v744_v5  ;;  %v2519_v19 = vcombine.high %v737_v4, %v744_v5 }
 0x1de   :  { %v413_v12 = vcombine.low %v389_v6, %v405_v8  ;;  %v414_v13 = vcombine.high %v389_v6, %v405_v8  ;;  %v429_v14 = vcombine.low %v396_v7, %v412_v9  ;;  %v430_v15 = vcombine.high %v396_v7, %v412_v9 }
 0x1df   :  { %v749_v28 = vcombine.low %v3242_v23, %v672_v11  ;;  %v750_v29 = vcombine.high %v3242_v23, %v672_v11  ;;  %v824_v48 = vrot.slane %v817_v16, %v3264_v43  ;;  %v832_v49 = vrot.slane %v2518_v17, %v3264_v43 }
 0x1e0   :  { %v421_v20 = vrot.slane %v413_v12, %v3266_v50  ;;  %v428_v21 = vrot.slane %v414_v13, %v3266_v50  ;;  %v437_v22 = vrot.slane %v429_v14, %v3266_v50  ;;  %v444_v24 = vrot.slane %v430_v15, %v3266_v50  ;;  %v678_v26 = vpop.permute.xlu0 %677  ;;  %v366_v27 = vpop.permute.xlu1 %365 }
 0x1e1   :  { %v765_v30 = vcombine.low %v666_v10, %v678_v26  ;;  %v766_v31 = vcombine.high %v666_v10, %v678_v26  ;;  %v757_v37 = vrot.slane %v749_v28, %v3264_v43  ;;  %v764_v38 = vrot.slane %v750_v29, %v3264_v43 }
 0x1e2   :  { %v517_v32 = vcombine.low %v421_v20, %v428_v21  ;;  %v2514_v33 = vcombine.high %v421_v20, %v428_v21  ;;  %v533_v34 = vcombine.low %v437_v22, %v444_v24  ;;  %v2515_v36 = vcombine.high %v437_v22, %v444_v24 }
 0x1e3   :  { %v773_v39 = vrot.slane %v765_v30, %v3264_v43  ;;  %v780_v40 = vrot.slane %v766_v31, %v3264_v43  ;;  %v840_v51 = vrot.slane %v833_v18, %v3264_v43  ;;  %v848_v52 = vrot.slane %v2519_v19, %v3264_v43 }
 0x1e4   :  { %v372_v47 = vpop.permute.xlu0 %371  ;;  %v378_v23 = vpop.permute.xlu1 %377  ;;  %v3295_v53 = vrot.slane %v517_v32, %v3264_v43  ;;  %v3298_v54 = vrot.slane %v2514_v33, %v3264_v43  ;;  %v3301_v55 = vrot.slane %v533_v34, %v3264_v43  ;;  %v3304_v56 = vrot.slane %v2515_v36, %v3264_v43 }
 0x1e5   :  { %v781_v42 = vcombine.low %v757_v37, %v773_v39  ;;  %v782_v44 = vcombine.high %v757_v37, %v773_v39  ;;  %v797_v45 = vcombine.low %v764_v38, %v780_v40  ;;  %v798_v46 = vcombine.high %v764_v38, %v780_v40 }
 0x1e6   :  { %v449_v57 = vcombine.low %v3248_v25, %v372_v47  ;;  %v450_v58 = vcombine.high %v3248_v25, %v372_v47  ;;  %v465_v59 = vcombine.low %v366_v27, %v378_v23  ;;  %v466_v60 = vcombine.high %v366_v27, %v378_v23 }
 0x1e7   :  { %v789_v61 = vrot.slane %v781_v42, %v3266_v50  ;;  %v796_v62 = vrot.slane %v782_v44, %v3266_v50  ;;  %v805_v63 = vrot.slane %v797_v45, %v3266_v50  ;;  %v812_v1 = vrot.slane %v798_v46, %v3266_v50 }
 0x1e8   :  { %v457_v2 = vrot.slane %v449_v57, %v3264_v43  ;;  %v464_v3 = vrot.slane %v450_v58, %v3264_v43  ;;  %v473_v4 = vrot.slane %v465_v59, %v3264_v43  ;;  %v480_v5 = vrot.slane %v466_v60, %v3264_v43 }
 0x1e9   :  { %v549_v25 = vcombine.low %v3295_v53, %v3298_v54  ;;  %v565_v6 = vcombine.low %v3301_v55, %v3304_v56  ;;  %v885_v9 = vcombine.low %v789_v61, %v796_v62  ;;  %v2520_v10 = vcombine.high %v789_v61, %v796_v62 }
 0x1ea   :  { %v481_v7 = vcombine.low %v457_v2, %v473_v4  ;;  %v482_v8 = vcombine.high %v457_v2, %v473_v4  ;;  %v849_v11 = vcombine.low %v824_v48, %v832_v49  ;;  %v865_v12 = vcombine.low %v840_v51, %v848_v52 }
 0x1eb   :  { %v901_v13 = vcombine.low %v805_v63, %v812_v1  ;;  %v2521_v14 = vcombine.high %v805_v63, %v812_v1  ;;  %v497_v15 = vcombine.low %v464_v3, %v480_v5  ;;  %v498_v16 = vcombine.high %v464_v3, %v480_v5 }
 0x1ec   :  { %v550_v17 = vcombine.high %v3295_v53, %v3298_v54  ;;  %v566_v18 = vcombine.high %v3301_v55, %v3304_v56  ;;  %v857_v19 = vrot.slane %v849_v11, %v3266_v50  ;;  %v873_v20 = vrot.slane %v865_v12, %v3266_v50 }
 0x1ed   :  { %v489_v21 = vrot.slane %v481_v7, %v3266_v50  ;;  %v496_v22 = vrot.slane %v482_v8, %v3266_v50  ;;  %v557_v24 = vrot.slane %v549_v25, %v3266_v50  ;;  %v573_v26 = vrot.slane %v565_v6, %v3266_v50 }
 0x1ee   :  { %v3331_v27 = vrot.slane %v885_v9, %v3264_v43  ;;  %v900_v28 = vrot.slane %v2520_v10, %v3264_v43  ;;  %v881_v29 = vcombine.low %v857_v19, %v873_v20  ;;  %v882_v30 = vcombine.high %v857_v19, %v873_v20 }
 0x1ef   :  { %v908_v31 = vrot.slane %v901_v13, %v3264_v43  ;;  %v916_v32 = vrot.slane %v2521_v14, %v3264_v43  ;;  %v505_v33 = vrot.slane %v497_v15, %v3266_v50  ;;  %v512_v34 = vrot.slane %v498_v16, %v3266_v50 }
 0x1f0   :  { %v953_v36 = vpack.c.bf16 %v881_v29, %v881_v29  ;;  %v954_v37 = vpack.c.bf16 %v882_v30, %v882_v30  ;;  %v850_v38 = vcombine.high %v824_v48, %v832_v49  ;;  %v866_v39 = vcombine.high %v840_v51, %v848_v52 }
 0x1f1   :  { %v585_v40 = vcombine.low %v489_v21, %v496_v22  ;;  %v2516_v42 = vcombine.high %v489_v21, %v496_v22  ;;  %v581_v44 = vcombine.low %v557_v24, %v573_v26  ;;  %v582_v45 = vcombine.high %v557_v24, %v573_v26 }
 0x1f2   :  { %v1276_v46 = vsel %vm1271_vm2, %v953_v36, 0  ;;  %v1322_v47 = vsel %vm1271_vm2, %v954_v37, 0  ;;  %v864_v23 = vrot.slane %v850_v38, %v3266_v50  ;;  %v880_v53 = vrot.slane %v866_v39, %v3266_v50 }
 0x1f3   :  { %v601_v54 = vcombine.low %v505_v33, %v512_v34  ;;  %v2517_v55 = vcombine.high %v505_v33, %v512_v34  ;;  %2625 = vmatpush3.bf16.xpose.msra.mxu1 %v1276_v46  ;;  %2631 = vmatpush3.bf16.xpose.msra.mxu0 %v1322_v47  ;;  %v917_v56 = vcombine.low %v3331_v27, %v900_v28  ;;  %v2553_v47 = vld [vmem:[#allocation8] sm:$0xf]  }
 0x1f4   :  { %2636 = vmatprep.subr.bf16.mxu1 %v3006_v0  ;;  %2642 = vmatprep.subr.bf16.mxu0 %v3006_v0  ;;  %v883_v48 = vcombine.low %v864_v23, %v880_v53  ;;  %v884_v49 = vcombine.high %v864_v23, %v880_v53  ;;  %v933_v51 = vcombine.low %v908_v31, %v916_v32  ;;  %v2554_v23 = vunpack.c.0.s8 %v2553_v47 }
 0x1f5   :  { %v925_v58 = vrot.slane %v917_v56, %v3266_v50  ;;  %v592_v60 = vrot.slane %v585_v40, %v3264_v43  ;;  %v600_v61 = vrot.slane %v2516_v42, %v3264_v43  ;;  %v653_v62 = vpack.c.bf16 %v581_v44, %v581_v44 }
 0x1f6   :  { %v955_v52 = vpack.c.bf16 %v883_v48, %v883_v48  ;;  %v956_v57 = vpack.c.bf16 %v884_v49, %v884_v49  ;;  %v941_v59 = vrot.slane %v933_v51, %v3266_v50  ;;  %v654_v63 = vpack.c.bf16 %v582_v45, %v582_v45 }
 0x1f7   :  { %v608_v1 = vrot.slane %v601_v54, %v3264_v43  ;;  %v616_v2 = vrot.slane %v2517_v55, %v3264_v43  ;;  %v564_v3 = vrot.slane %v550_v17, %v3266_v50  ;;  %v580_v4 = vrot.slane %v566_v18, %v3266_v50 }
 0x1f8   :  { %v918_v5 = vcombine.high %v3331_v27, %v900_v28  ;;  %v934_v25 = vcombine.high %v908_v31, %v916_v32  ;;  %v1368_v6 = vsel %vm1271_vm2, %v955_v52, 0  ;;  %v1414_v7 = vsel %vm1271_vm2, %v956_v57, 0 }
 0x1f9   :  { %v949_v8 = vcombine.low %v925_v58, %v941_v59  ;;  %v950_v9 = vcombine.high %v925_v58, %v941_v59  ;;  %v617_v10 = vcombine.low %v592_v60, %v600_v61  ;;  %v633_v11 = vcombine.low %v608_v1, %v616_v2 }
 0x1fa   :  { %2627 = vmatmul.mubr.msk.bf16.vlgmr.msra.gmra.mrb[4].mxu1 %vm1271_vm2, %v653_v62  ;;  %2633 = vmatmul.mubr.msk.bf16.vlgmr.msra.gmra.mrb[8].mxu0 %vm1271_vm2, %v654_v63  ;;  %v583_v12 = vcombine.low %v564_v3, %v580_v4  ;;  %v584_v13 = vcombine.high %v564_v3, %v580_v4  ;;  %v932_v16 = vrot.slane %v918_v5, %v3266_v50  ;;  %v1265_v53 = vcvt.s32.f32 %v2554_v23 }
 0x1fb   :  { %2637 = vmatpush3.bf16.xpose.msra.mxu1 %v1368_v6  ;;  %2643 = vmatpush3.bf16.xpose.msra.mxu0 %v1414_v7  ;;  %v957_v14 = vpack.c.bf16 %v949_v8, %v949_v8  ;;  %v958_v15 = vpack.c.bf16 %v950_v9, %v950_v9  ;;  %v948_v17 = vrot.slane %v934_v25, %v3266_v50  ;;  %v2555_v58 = vunpack.c.1.s8 %v2553_v47 }
 0x1fc   :  { %2638 = vmatprep.mubr.msk.bf16.mxu1 %vm3007_vm0, %v3006_v0  ;;  %2644 = vmatprep.mubr.msk.bf16.mxu0 %vm3007_vm0, %v3006_v0  ;;  %v655_v18 = vpack.c.bf16 %v583_v12, %v583_v12  ;;  %v656_v19 = vpack.c.bf16 %v584_v13, %v584_v13  ;;  %v625_v20 = vrot.slane %v617_v10, %v3266_v50  ;;  %v2526_v54 = vadd.f32 -1.0, %v1265_v53 }
 0x1fd   :  { %2648 = vmatprep.subr.bf16.mxu1 %v3006_v0  ;;  %2654 = vmatprep.subr.bf16.mxu0 %v3006_v0  ;;  %v641_v21 = vrot.slane %v633_v11, %v3266_v50  ;;  %v1460_v22 = vsel %vm1271_vm2, %v957_v14, 0  ;;  %v1506_v24 = vsel %vm1271_vm2, %v958_v15, 0  ;;  %v951_v26 = vcombine.low %v932_v16, %v948_v17 }
 0x1fe   :  { %v952_v27 = vcombine.high %v932_v16, %v948_v17  ;;  %v618_v28 = vcombine.high %v592_v60, %v600_v61  ;;  %v634_v29 = vcombine.high %v608_v1, %v616_v2  ;;  %v1269_v55 = vmul.f32 1e+09, %v2526_v54 }
 0x1ff   :  { %v649_v30 = vcombine.low %v625_v20, %v641_v21  ;;  %v650_v31 = vcombine.high %v625_v20, %v641_v21  ;;  %v959_v32 = vpack.c.bf16 %v951_v26, %v951_v26  ;;  %v1266_v2 = vcvt.s32.f32 %v2555_v58 }
 0x200   :  { %v960_v33 = vpack.c.bf16 %v952_v27, %v952_v27  ;;  %v632_v37 = vrot.slane %v618_v28, %v3266_v50  ;;  %v648_v38 = vrot.slane %v634_v29, %v3266_v50 }
 0x201   :  { %v657_v34 = vpack.c.bf16 %v649_v30, %v649_v30  ;;  %v658_v36 = vpack.c.bf16 %v650_v31, %v650_v31  ;;  %v1552_v39 = vsel %vm1271_vm2, %v959_v32, 0  ;;  %v2527_v7 = vadd.f32 -1.0, %v1266_v2 }
 0x202   :  { %2639 = vmatmul.mubr.msk.bf16.vlgmr.msra.gmra.mrb[8].mxu1 %vm1271_vm2, %v655_v18  ;;  %2645 = vmatmul.mubr.msk.bf16.vlgmr.msra.gmra.mrb[12].mxu0 %vm1271_vm2, %v656_v19  ;;  %v1598_v40 = vsel %vm1271_vm2, %v960_v33, 0  ;;  %v651_v42 = vcombine.low %v632_v37, %v648_v38  ;;  %v652_v44 = vcombine.high %v632_v37, %v648_v38 }
 0x203   :  { %2649 = vmatpush3.bf16.xpose.msra.mxu1 %v1460_v22  ;;  %2655 = vmatpush3.bf16.xpose.msra.mxu0 %v1506_v24  ;;  %v1270_v14 = vmul.f32 1e+09, %v2527_v7 }
 0x204   :  { %2650 = vmatprep.mubr.msk.bf16.mxu1 %vm3007_vm0, %v3006_v0  ;;  %2656 = vmatprep.mubr.msk.bf16.mxu0 %vm3007_vm0, %v3006_v0  ;;  %v659_v45 = vpack.c.bf16 %v651_v42, %v651_v42  ;;  %v660_v46 = vpack.c.bf16 %v652_v44, %v652_v44 }
 0x205   :  { %2660 = vmatprep.subr.bf16.mxu1 %v3006_v0  ;;  %2666 = vmatprep.subr.bf16.mxu0 %v3006_v0 }
 0x20a   :  { %2651 = vmatmul.mubr.msk.bf16.vlgmr.msra.gmra.mrb[12].mxu1 %vm1271_vm2, %v657_v34  ;;  %2657 = vmatmul.mubr.msk.bf16.vlgmr.msra.gmra.mrb[16].mxu0 %vm1271_vm2, %v658_v36 }
 0x20b   :  { %2661 = vmatpush3.bf16.xpose.msra.mxu1 %v1552_v39  ;;  %2667 = vmatpush3.bf16.xpose.msra.mxu0 %v1598_v40 }
 0x20c   :  { %2662 = vmatprep.mubr.msk.bf16.mxu1 %vm3007_vm0, %v3006_v0  ;;  %2668 = vmatprep.mubr.msk.bf16.mxu0 %vm3007_vm0, %v3006_v0 }
 0x20d   :  { %2672 = vmatprep.subr.bf16.mxu1 %v3006_v0  ;;  %2678 = vmatprep.subr.bf16.mxu0 %v3006_v0 }
 0x212   :  { %2663 = vmatmul.mubr.msk.bf16.vlgmr.msra.gmra.mrb[16].mxu1 %vm1271_vm2, %v659_v45  ;;  %2669 = vmatmul.mubr.msk.bf16.vlgmr.msra.gmra.mrb[20].mxu0 %vm1271_vm2, %v660_v46  ;;  %v964_v45 = vpop.permute.xlu1 %963 }
 0x213   :  { %2674 = vmatprep.mubr.msk.bf16.mxu1 %vm3007_vm0, %v3006_v0  ;;  %2680 = vmatprep.mubr.msk.bf16.mxu0 %vm3007_vm0, %v3006_v0 }
 0x2cd   :  { %v1312_v56 = vpop.f32.mrb[4].mxu1  ;;  %v1358_v48 = vpop.f32.mrb[8].mxu0 }
 0x2ce   :  { %v3396_v49 = vadd.f32 %v1312_v56, %v1269_v55  ;;  %v3398_v51 = vadd.f32 %v1358_v48, %v1269_v55  ;;  %v2628_v52 = vpop.f32.mrb[5].mxu1  ;;  %v2634_v57 = vpop.f32.mrb[9].mxu0 }
 0x2cf   :  { %v1315_v59 = vpop.f32.mrb[6].mxu1  ;;  %v1361_v60 = vpop.f32.mrb[10].mxu0 }
 0x2d0   :  { %v2629_v61 = vpop.f32.mrb[7].mxu1  ;;  %v2635_v62 = vpop.f32.mrb[11].mxu0  ;;  %v1640_v63 = vsel %vm1271_vm2, %v3396_v49, -inf  ;;  %v1643_v1 = vsel %vm1271_vm2, %v3398_v51, -inf }
 0x2d1   :  { %1641 = vmax.xlane.f32.xlu0 %v1640_v63  ;;  %1644 = vmax.xlane.f32.xlu1 %v1643_v1 }
 0x2d5   :  { %v1404_v3 = vpop.f32.mrb[8].mxu1  ;;  %v1450_v4 = vpop.f32.mrb[12].mxu0 }
 0x2d6   :  { %v1405_v5 = vadd.f32 %v1404_v3, %v1269_v55  ;;  %v2640_v25 = vpop.f32.mrb[9].mxu1  ;;  %v2646_v6 = vpop.f32.mrb[13].mxu0  ;;  %v1451_v10 = vadd.f32 %v1450_v4, %v1269_v55 }
 0x2d7   :  { %v1407_v8 = vpop.f32.mrb[10].mxu1  ;;  %v1453_v9 = vpop.f32.mrb[14].mxu0 }
 0x2d8   :  { %v2641_v11 = vpop.f32.mrb[11].mxu1  ;;  %v2647_v12 = vpop.f32.mrb[15].mxu0  ;;  %v1646_v13 = vsel %vm1271_vm2, %v1405_v5, -inf  ;;  %v1649_v15 = vsel %vm1271_vm2, %v1451_v10, -inf }
 0x2d9   :  { %1647 = vmax.xlane.f32.xlu0 %v1646_v13 }
 0x2dd   :  { %v1496_v16 = vpop.f32.mrb[12].mxu1  ;;  %1650 = vmax.xlane.f32.xlu0 %v1649_v15  ;;  %v1542_v17 = vpop.f32.mrb[16].mxu0 }
 0x2de   :  { %v1497_v18 = vadd.f32 %v1496_v16, %v1270_v14  ;;  %v3406_v19 = vadd.f32 %v1542_v17, %v1270_v14  ;;  %v2652_v20 = vpop.f32.mrb[13].mxu1  ;;  %v2658_v21 = vpop.f32.mrb[17].mxu0 }
 0x2df   :  { %v1499_v22 = vpop.f32.mrb[14].mxu1  ;;  %v1545_v24 = vpop.f32.mrb[18].mxu0 }
 0x2e0   :  { %v2653_v26 = vpop.f32.mrb[15].mxu1  ;;  %v2659_v27 = vpop.f32.mrb[19].mxu0  ;;  %v1652_v28 = vsel %vm1271_vm2, %v1497_v18, -inf  ;;  %v1655_v29 = vsel %vm1271_vm2, %v3406_v19, -inf }
 0x2e1   :  { %1653 = vmax.xlane.f32.xlu1 %v1652_v28  ;;  %1656 = vmax.xlane.f32.xlu0 %v1655_v29 }
 0x2e5   :  { %v1588_v30 = vpop.f32.mrb[16].mxu1  ;;  %v1634_v31 = vpop.f32.mrb[20].mxu0 }
 0x2e6   :  { %v3411_v32 = vadd.f32 %v1588_v30, %v1270_v14  ;;  %v3413_v33 = vadd.f32 %v1634_v31, %v1270_v14  ;;  %v2664_v34 = vpop.f32.mrb[17].mxu1  ;;  %v2670_v36 = vpop.f32.mrb[21].mxu0 }
 0x2e7   :  { %v1591_v37 = vpop.f32.mrb[18].mxu1  ;;  %v1637_v38 = vpop.f32.mrb[22].mxu0 }
 0x2e8   :  { %v2665_v39 = vpop.f32.mrb[19].mxu1  ;;  %v2671_v40 = vpop.f32.mrb[23].mxu0  ;;  %v1658_v42 = vsel %vm1271_vm2, %v3411_v32, -inf  ;;  %v1661_v44 = vsel %vm1271_vm2, %v3413_v33, -inf }
 0x2e9   :  { %1659 = vmax.xlane.f32.xlu1 %v1658_v42  ;;  %1662 = vmax.xlane.f32.xlu0 %v1661_v44 }
 0x2fa   :  { %975 = vrot.lane.b32.xlu1 %v3258_v35, %s3008_s14 }
 0x2ff   :  { %969 = vrot.lane.b32.xlu0 %v3258_v35, %s3010_s7 }
 0x35e   :  { %v1642_v46 = vpop.xlane.xlu0 %1641  ;;  %v1645_v47 = vpop.xlane.xlu1 %1644 }
 0x35f   :  { %v1664_v23 = vsub.f32 %v3396_v49, %v1642_v46  ;;  %v1665_v53 = vsub.f32 %v3398_v51, %v1645_v47 }
 0x361   :  { %v1672_v54 = vmul.f32 1.442695, %v1664_v23  ;;  %v1674_v55 = vmul.f32 1.442695, %v1665_v53 }
 0x363   :  { %2777 = vpow2.f32 %v1672_v54 }
 0x364   :  { %2779 = vpow2.f32 %v1674_v55 }
 0x366   :  { %v1648_v56 = vpop.xlane.xlu0 %1647 }
 0x367   :  { %v1666_v48 = vsub.f32 %v1405_v5, %v1648_v56 }
 0x369   :  { %v1676_v52 = vmul.f32 1.442695, %v1666_v48 }
 0x36a   :  { %v1651_v57 = vpop.xlane.xlu0 %1650 }
 0x36b   :  { %2781 = vpow2.f32 %v1676_v52  ;;  %v1667_v58 = vsub.f32 %v1451_v10, %v1651_v57 }
 0x36d   :  { %v3425_v59 = vpop.eup %2777  ;;  %v1678_v60 = vmul.f32 1.442695, %v1667_v58 }
 0x36e   :  { %v3427_v61 = vpop.eup %2779  ;;  %v1654_v62 = vpop.xlane.xlu1 %1653  ;;  %v1688_v49 = vsel %vm1271_vm2, %v3425_v59, 0.0 }
 0x36f   :  { %2783 = vpow2.f32 %v1678_v60  ;;  %v1668_v51 = vsub.f32 %v1497_v18, %v1654_v62  ;;  %1689 = vadd.xlane.f32.xlu1 %v1688_v49  ;;  %v1691_v63 = vsel %vm1271_vm2, %v3427_v61, 0.0  ;;  %v3433_v2 = vpop.xlane.xlu0 %1656 }
 0x370   :  { %1692 = vadd.xlane.f32.xlu0 %v1691_v63  ;;  %v1669_v49 = vsub.f32 %v3406_v19, %v3433_v2 }
 0x371   :  { %v1680_v1 = vmul.f32 1.442695, %v1668_v51 }
 0x372   :  { %v1682_v51 = vmul.f32 1.442695, %v1669_v49 }
 0x373   :  { %2785 = vpow2.f32 %v1680_v1 }
 0x374   :  { %2787 = vpow2.f32 %v1682_v51 }
 0x375   :  { %v3435_v3 = vpop.eup %2781 }
 0x376   :  { %v3437_v4 = vpop.xlane.xlu1 %1659  ;;  %v3439_v5 = vpop.xlane.xlu0 %1662  ;;  %v1694_v25 = vsel %vm1271_vm2, %v3435_v3, 0.0 }
 0x377   :  { %1695 = vadd.xlane.f32.xlu1 %v1694_v25  ;;  %v1670_v63 = vsub.f32 %v3411_v32, %v3437_v4  ;;  %v1671_v19 = vsub.f32 %v3413_v33, %v3439_v5 }
 0x379   :  { %v3443_v6 = vpop.eup %2783  ;;  %v1684_v1 = vmul.f32 1.442695, %v1670_v63  ;;  %v1686_v32 = vmul.f32 1.442695, %v1671_v19 }
 0x37a   :  { %v976_v7 = vpop.permute.xlu1 %975  ;;  %v970_v8 = vpop.permute.xlu0 %969  ;;  %v1697_v9 = vsel %vm1271_vm2, %v3443_v6, 0.0 }
 0x37b   :  { %v997_v10 = vcombine.low %v964_v45, %v976_v7  ;;  %v998_v11 = vcombine.high %v964_v45, %v976_v7  ;;  %v981_v12 = vcombine.low %v3258_v35, %v970_v8  ;;  %1698 = vadd.xlane.f32.xlu0 %v1697_v9  ;;  %v982_v13 = vcombine.high %v3258_v35, %v970_v8 }
 0x37c   :  { %2789 = vpow2.f32 %v1684_v1 }
 0x37d   :  { %v3449_v14 = vpop.eup %2785  ;;  %v1005_v15 = vrot.slane %v997_v10, %v3264_v43  ;;  %v1012_v16 = vrot.slane %v998_v11, %v3264_v43  ;;  %v989_v17 = vrot.slane %v981_v12, %v3264_v43  ;;  %v996_v18 = vrot.slane %v982_v13, %v3264_v43 }
 0x37e   :  { %v1700_v20 = vsel %vm1271_vm2, %v3449_v14, 0.0  ;;  %v3481_v25 = vpop.eup %2787  ;;  %2791 = vpow2.f32 %v1686_v32 }
 0x37f   :  { %v1013_v21 = vcombine.low %v989_v17, %v1005_v15  ;;  %v1014_v22 = vcombine.high %v989_v17, %v1005_v15  ;;  %1701 = vadd.xlane.f32.xlu0 %v1700_v20  ;;  %v1029_v24 = vcombine.low %v996_v18, %v1012_v16  ;;  %v1030_v26 = vcombine.high %v996_v18, %v1012_v16 }
 0x380   :  { %v1703_v7 = vsel %vm1271_vm2, %v3481_v25, 0.0 }
 0x381   :  { %v1021_v35 = vrot.slane %v1013_v21, %v3266_v50  ;;  %v1028_v27 = vrot.slane %v1014_v22, %v3266_v50  ;;  %v1037_v28 = vrot.slane %v1029_v24, %v3266_v50  ;;  %v1044_v29 = vrot.slane %v1030_v26, %v3266_v50 }
 0x383   :  { %v1117_v30 = vcombine.low %v1021_v35, %v1028_v27  ;;  %v2522_v31 = vcombine.high %v1021_v35, %v1028_v27  ;;  %v1133_v34 = vcombine.low %v1037_v28, %v1044_v29  ;;  %v2523_v36 = vcombine.high %v1037_v28, %v1044_v29 }
 0x385   :  { %v1124_v37 = vrot.slane %v1117_v30, %v3264_v43  ;;  %v1132_v38 = vrot.slane %v2522_v31, %v3264_v43  ;;  %v1140_v39 = vrot.slane %v1133_v34, %v3264_v43  ;;  %v1148_v40 = vrot.slane %v2523_v36, %v3264_v43 }
 0x386   :  { %v3485_v8 = vpop.eup %2789 }
 0x387   :  { %v1149_v42 = vcombine.low %v1124_v37, %v1132_v38  ;;  %v1150_v44 = vcombine.high %v1124_v37, %v1132_v38  ;;  %v1165_v45 = vcombine.low %v1140_v39, %v1148_v40  ;;  %v1166_v46 = vcombine.high %v1140_v39, %v1148_v40 }
 0x388   :  { %971 = vrot.lane.b32.xlu1 %v3262_v41, %s3010_s7  ;;  %v1706_v9 = vsel %vm1271_vm2, %v3485_v8, 0.0  ;;  %v3493_v2 = vpop.eup %2791 }
 0x389   :  { %v1157_v47 = vrot.slane %v1149_v42, %v3266_v50  ;;  %v1164_v23 = vrot.slane %v1150_v44, %v3266_v50  ;;  %v1173_v53 = vrot.slane %v1165_v45, %v3266_v50  ;;  %v1180_v54 = vrot.slane %v1166_v46, %v3266_v50 }
 0x38a   :  { %v1709_v4 = vsel %vm1271_vm2, %v3493_v2, 0.0 }
 0x38b   :  { %v1181_v55 = vcombine.low %v1157_v47, %v1173_v53  ;;  %v1182_v56 = vcombine.high %v1157_v47, %v1173_v53  ;;  %v1183_v48 = vcombine.low %v1164_v23, %v1180_v54  ;;  %v1184_v52 = vcombine.high %v1164_v23, %v1180_v54 }
 0x38d   :  { %v1253_v57 = vpack.c.bf16 %v1181_v55, %v1181_v55  ;;  %v1254_v58 = vpack.c.bf16 %v1182_v56, %v1182_v56  ;;  %v1255_v33 = vpack.c.bf16 %v1183_v48, %v1183_v48  ;;  %v1256_v18 = vpack.c.bf16 %v1184_v52, %v1184_v52 }
 0x38f   :  { %v1741_v60 = vsel %vm1739_vm3, %v1253_v57, 0  ;;  %v1787_v62 = vsel %vm1739_vm3, %v1254_v58, 0  ;;  %v1833_v22 = vsel %vm1739_vm3, %v1255_v33, 0  ;;  %v1879_v24 = vsel %vm1739_vm3, %v1256_v18, 0 }
 0x390   :  { %2673 = vmatpush3.bf16.msra.mxu1 %v1741_v60  ;;  %2679 = vmatpush3.bf16.msra.mxu0 %v1787_v62 }
 0x391   :  { %2684 = vmatprep.subr.bf16.mxu1 %v3006_v0  ;;  %2690 = vmatprep.subr.bf16.mxu0 %v3006_v0 }
 0x395   :  { %965 = vrot.lane.b32.xlu0 %v3262_v41, %s3009_s21 }
 0x3ac   :  { %1704 = vadd.xlane.f32.xlu1 %v1703_v7 }
 0x3b4   :  { %1707 = vadd.xlane.f32.xlu0 %v1706_v9 }
 0x3bd   :  { %977 = vrot.lane.b32.xlu1 %v3262_v41, %s3008_s14 }
 0x3e1   :  { %1710 = vadd.xlane.f32.xlu1 %v1709_v4 }
 0x3fc   :  { %v1690_v10 = vpop.xlane.xlu1 %1689 }
 0x3fd   :  { %2793 = vrcp.f32 %v1690_v10  ;;  %v1693_v11 = vpop.xlane.xlu0 %1692 }
 0x3fe   :  { %2795 = vrcp.f32 %v1693_v11 }
 0x404   :  { %v1696_v12 = vpop.xlane.xlu1 %1695 }
 0x405   :  { %2797 = vrcp.f32 %v1696_v12 }
 0x407   :  { %v2794_v13 = vpop.eup %2793 }
 0x408   :  { %v2796_v15 = vpop.eup %2795  ;;  %v1720_v16 = vmul.f32 %v2794_v13, %v3425_v59  ;;  %v1699_v17 = vpop.xlane.xlu0 %1698 }
 0x409   :  { %v1721_v5 = vmul.f32 %v2796_v15, %v3427_v61  ;;  %2799 = vrcp.f32 %v1699_v17  ;;  %v972_v29 = vpop.permute.xlu1 %971 }
 0x40a   :  { %v1728_v20 = vpack.c.bf16 %v1720_v16, %v1720_v16  ;;  %v1049_v31 = vcombine.low %v3262_v41, %v972_v29  ;;  %v1050_v34 = vcombine.high %v3262_v41, %v972_v29 }
 0x40b   :  { %v1729_v21 = vpack.c.bf16 %v1721_v5, %v1721_v5 }
 0x40c   :  { %2675 = vmatmul.mubr.msk.bf16.vlgmr.msra.gmra.mrb[20].mxu1 %vm1271_vm2, %v1728_v20  ;;  %v1702_v30 = vpop.xlane.xlu0 %1701  ;;  %v1057_v39 = vrot.slane %v1049_v31, %v3264_v43  ;;  %v1064_v40 = vrot.slane %v1050_v34, %v3264_v43 }
 0x40d   :  { %2681 = vmatmul.mubr.msk.bf16.vlgmr.msra.gmra.mrb[24].mxu0 %vm1271_vm2, %v1729_v21  ;;  %2685 = vmatpush3.bf16.msra.mxu1 %v1833_v22  ;;  %2801 = vrcp.f32 %v1702_v30 }
 0x40e   :  { %2691 = vmatpush3.bf16.msra.mxu0 %v1879_v24  ;;  %2686 = vmatprep.mubr.msk.bf16.mxu1 %vm3007_vm0, %v3006_v0 }
 0x40f   :  { %v2798_v59 = vpop.eup %2797  ;;  %2692 = vmatprep.mubr.msk.bf16.mxu0 %vm3007_vm0, %v3006_v0  ;;  %2696 = vmatprep.subr.bf16.mxu1 %v3006_v0 }
 0x410   :  { %v1722_v61 = vmul.f32 %v2798_v59, %v3435_v3  ;;  %2702 = vmatprep.subr.bf16.mxu0 %v3006_v0  ;;  %v966_v36 = vpop.permute.xlu0 %965 }
 0x412   :  { %v1730_v26 = vpack.c.bf16 %v1722_v61, %v1722_v61 }
 0x413   :  { %v2800_v35 = vpop.eup %2799 }
 0x414   :  { %v1723_v27 = vmul.f32 %v2800_v35, %v3443_v6  ;;  %2687 = vmatmul.mubr.msk.bf16.vlgmr.msra.gmra.mrb[24].mxu1 %vm1271_vm2, %v1730_v26 }
 0x415   :  { %2698 = vmatprep.mubr.msk.bf16.mxu1 %vm3007_vm0, %v3006_v0 }
 0x416   :  { %v1731_v28 = vpack.c.bf16 %v1723_v27, %v1723_v27 }
 0x417   :  { %v2802_v19 = vpop.eup %2801 }
 0x418   :  { %2693 = vmatmul.mubr.msk.bf16.vlgmr.msra.gmra.mrb[28].mxu0 %vm1271_vm2, %v1731_v28  ;;  %v1724_v33 = vmul.f32 %v2802_v19, %v3449_v14 }
 0x419   :  { %2704 = vmatprep.mubr.msk.bf16.mxu0 %vm3007_vm0, %v3006_v0 }
 0x41a   :  { %v1732_v61 = vpack.c.bf16 %v1724_v33, %v1724_v33 }
 0x439   :  { %v1705_v3 = vpop.xlane.xlu1 %1704 }
 0x43a   :  { %2803 = vrcp.f32 %v1705_v3 }
 0x43d   :  { %v978_v6 = vpop.permute.xlu1 %977 }
 0x43e   :  { %v1065_v37 = vcombine.low %v966_v36, %v978_v6  ;;  %v1066_v38 = vcombine.high %v966_v36, %v978_v6 }
 0x440   :  { %v1073_v42 = vrot.slane %v1065_v37, %v3264_v43  ;;  %v1080_v44 = vrot.slane %v1066_v38, %v3264_v43 }
 0x441   :  { %v1708_v51 = vpop.xlane.xlu0 %1707 }
 0x442   :  { %v1081_v45 = vcombine.low %v1057_v39, %v1073_v42  ;;  %v1082_v46 = vcombine.high %v1057_v39, %v1073_v42  ;;  %v1097_v47 = vcombine.low %v1064_v40, %v1080_v44  ;;  %v1098_v23 = vcombine.high %v1064_v40, %v1080_v44 }
 0x443   :  { %2805 = vrcp.f32 %v1708_v51 }
 0x444   :  { %v1089_v41 = vrot.slane %v1081_v45, %v3266_v50  ;;  %v1096_v53 = vrot.slane %v1082_v46, %v3266_v50  ;;  %v1105_v54 = vrot.slane %v1097_v47, %v3266_v50  ;;  %v1112_v55 = vrot.slane %v1098_v23, %v3266_v50  ;;  %v2804_v12 = vpop.eup %2803 }
 0x445   :  { %v1725_v5 = vmul.f32 %v2804_v12, %v3481_v25 }
 0x446   :  { %v1185_v56 = vcombine.low %v1089_v41, %v1096_v53  ;;  %v2524_v48 = vcombine.high %v1089_v41, %v1096_v53  ;;  %v1201_v52 = vcombine.low %v1105_v54, %v1112_v55  ;;  %v2525_v57 = vcombine.high %v1105_v54, %v1112_v55 }
 0x447   :  { %v1733_v26 = vpack.c.bf16 %v1725_v5, %v1725_v5 }
 0x448   :  { %v1192_v58 = vrot.slane %v1185_v56, %v3264_v43  ;;  %v1200_v60 = vrot.slane %v2524_v48, %v3264_v43  ;;  %v1208_v62 = vrot.slane %v1201_v52, %v3264_v43  ;;  %v1216_v49 = vrot.slane %v2525_v57, %v3264_v43 }
 0x44a   :  { %v1217_v63 = vcombine.low %v1192_v58, %v1200_v60  ;;  %v1233_v1 = vcombine.low %v1208_v62, %v1216_v49  ;;  %v1218_v7 = vcombine.high %v1192_v58, %v1200_v60  ;;  %v1234_v9 = vcombine.high %v1208_v62, %v1216_v49 }
 0x44c   :  { %v1225_v32 = vrot.slane %v1217_v63, %v3266_v50  ;;  %v1241_v4 = vrot.slane %v1233_v1, %v3266_v50  ;;  %v1232_v10 = vrot.slane %v1218_v7, %v3266_v50  ;;  %v1248_v11 = vrot.slane %v1234_v9, %v3266_v50 }
 0x44d   :  { %v2806_v35 = vpop.eup %2805 }
 0x44e   :  { %v1249_v13 = vcombine.low %v1225_v32, %v1241_v4  ;;  %v1250_v15 = vcombine.high %v1225_v32, %v1241_v4  ;;  %v1251_v16 = vcombine.low %v1232_v10, %v1248_v11  ;;  %v1252_v17 = vcombine.high %v1232_v10, %v1248_v11 }
 0x44f   :  { %v1726_v27 = vmul.f32 %v2806_v35, %v3485_v8 }
 0x450   :  { %v1257_v18 = vpack.c.bf16 %v1249_v13, %v1249_v13  ;;  %v1258_v20 = vpack.c.bf16 %v1250_v15, %v1250_v15  ;;  %v1259_v24 = vpack.c.bf16 %v1251_v16, %v1251_v16  ;;  %v1260_v59 = vpack.c.bf16 %v1252_v17, %v1252_v17 }
 0x451   :  { %v1734_v28 = vpack.c.bf16 %v1726_v27, %v1726_v27 }
 0x452   :  { %v1925_v21 = vsel %vm1739_vm3, %v1257_v18, 0  ;;  %v1971_v22 = vsel %vm1739_vm3, %v1258_v20, 0  ;;  %v2017_v14 = vsel %vm1739_vm3, %v1259_v24, 0  ;;  %v2063_v25 = vsel %vm1739_vm3, %v1260_v59, 0 }
 0x453   :  { %2697 = vmatpush3.bf16.msra.mxu1 %v1925_v21  ;;  %2703 = vmatpush3.bf16.msra.mxu0 %v1971_v22 }
 0x454   :  { %2708 = vmatprep.subr.bf16.mxu1 %v3006_v0  ;;  %2714 = vmatprep.subr.bf16.mxu0 %v3006_v0 }
 0x456   :  { %2699 = vmatmul.mubr.msk.bf16.vlgmr.msra.gmra.mrb[28].mxu1 %vm1271_vm2, %v1732_v61  ;;  %2705 = vmatmul.mubr.msk.bf16.vlgmr.msra.gmra.mrb[32].mxu0 %vm1271_vm2, %v1733_v26 }
 0x457   :  { %2709 = vmatpush3.bf16.msra.mxu1 %v2017_v14  ;;  %2715 = vmatpush3.bf16.msra.mxu0 %v2063_v25 }
 0x458   :  { %2710 = vmatprep.mubr.msk.bf16.mxu1 %vm3007_vm0, %v3006_v0  ;;  %2716 = vmatprep.mubr.msk.bf16.mxu0 %vm3007_vm0, %v3006_v0 }
 0x459   :  { %2720 = vmatprep.subr.bf16.mxu1 %v3006_v0 }
 0x45e   :  { %2711 = vmatmul.mubr.msk.bf16.vlgmr.msra.gmra.mrb[32].mxu1 %vm1271_vm2, %v1734_v28 }
 0x45f   :  { %2724 = vmatprep.mubr.msk.bf16.mxu1 %vm3007_vm0, %v3006_v0 }
 0x46e   :  { %v1711_v29 = vpop.xlane.xlu1 %1710 }
 0x46f   :  { %2807 = vrcp.f32 %v1711_v29 }
 0x479   :  { %v2808_v30 = vpop.eup %2807 }
 0x47a   :  { %v1727_v3 = vmul.f32 %v2808_v30, %v3493_v2 }
 0x47c   :  { %v1735_v8 = vpack.c.bf16 %v1727_v3, %v1727_v3 }
 0x47e   :  { %2717 = vmatmul.mubr.msk.bf16.vlgmr.msra.gmra.mrb[36].mxu0 %vm1271_vm2, %v1735_v8 }
 0x4df   :  { %v1777_v31 = vpop.f32.mrb[20].mxu1 }
 0x4e0   :  { %v1823_v34 = vpop.f32.mrb[24].mxu0  ;;  %v2676_v36 = vpop.f32.mrb[21].mxu1 }
 0x4e1   :  { %v2682_v6 = vpop.f32.mrb[25].mxu0  ;;  %v1780_v37 = vpop.f32.mrb[22].mxu1 }
 0x4e2   :  { %v1826_v38 = vpop.f32.mrb[26].mxu0  ;;  %v2677_v39 = vpop.f32.mrb[23].mxu1 }
 0x4e3   :  { %v2683_v40 = vpop.f32.mrb[27].mxu0 }
 0x4e7   :  { %v1869_v42 = vpop.f32.mrb[24].mxu1 }
 0x4e8   :  { %v2105_v44 = vcombine.low %v1777_v31, %v1869_v42  ;;  %v2106_v45 = vcombine.high %v1777_v31, %v1869_v42  ;;  %v2688_v46 = vpop.f32.mrb[25].mxu1 }
 0x4e9   :  { %v1872_v47 = vpop.f32.mrb[26].mxu1 }
 0x4ea   :  { %v2689_v23 = vpop.f32.mrb[27].mxu1  ;;  %v2113_v56 = vrot.slane %v2105_v44, %v3264_v43  ;;  %v2120_v48 = vrot.slane %v2106_v45, %v3264_v43 }
 0x4eb   :  { %v1915_v41 = vpop.f32.mrb[28].mxu0 }
 0x4ec   :  { %v2121_v53 = vcombine.low %v1823_v34, %v1915_v41  ;;  %v2122_v2 = vcombine.high %v1823_v34, %v1915_v41  ;;  %v2694_v54 = vpop.f32.mrb[29].mxu0 }
 0x4ed   :  { %v1918_v55 = vpop.f32.mrb[30].mxu0 }
 0x4ee   :  { %v2129_v52 = vrot.slane %v2121_v53, %v3264_v43  ;;  %v2136_v57 = vrot.slane %v2122_v2, %v3264_v43  ;;  %v2695_v58 = vpop.f32.mrb[31].mxu0 }
 0x4f0   :  { %v2137_v60 = vcombine.low %v2113_v56, %v2129_v52  ;;  %v2138_v62 = vcombine.high %v2113_v56, %v2129_v52  ;;  %v2153_v49 = vcombine.low %v2120_v48, %v2136_v57  ;;  %v2154_v51 = vcombine.high %v2120_v48, %v2136_v57 }
 0x4f2   :  { %v2145_v63 = vrot.slane %v2137_v60, %v3266_v50  ;;  %v2152_v1 = vrot.slane %v2138_v62, %v3266_v50  ;;  %v2161_v7 = vrot.slane %v2153_v49, %v3266_v50  ;;  %v2168_v9 = vrot.slane %v2154_v51, %v3266_v50  ;;  %v2775_v51 = vld [vmem:[%s3646_s10] sm:$0xff]  }
 0x4f3   :  { %2721 = vmatpush3.bf16.msra.mxu1 %v2775_v51 }
 0x4f4   :  { %v2241_v19 = vcombine.low %v2145_v63, %v2152_v1  ;;  %v2544_v32 = vcombine.high %v2145_v63, %v2152_v1  ;;  %v2257_v4 = vcombine.low %v2161_v7, %v2168_v9  ;;  %v2545_v10 = vcombine.high %v2161_v7, %v2168_v9  ;;  %2722 = vmatprep.subr.bf16.mxu1 %v3006_v0 }
 0x4f6   :  { %v2248_v11 = vrot.slane %v2241_v19, %v3264_v43  ;;  %v2256_v12 = vrot.slane %v2544_v32, %v3264_v43  ;;  %v2264_v13 = vrot.slane %v2257_v4, %v3264_v43  ;;  %v2272_v15 = vrot.slane %v2545_v10, %v3264_v43 }
 0x4f8   :  { %v2274_v16 = vcombine.high %v2248_v11, %v2256_v12  ;;  %v2290_v17 = vcombine.high %v2264_v13, %v2272_v15  ;;  %v2273_v33 = vcombine.low %v2248_v11, %v2256_v12  ;;  %v2289_v5 = vcombine.low %v2264_v13, %v2272_v15 }
 0x4fa   :  { %v3569_v18 = vrot.slane %v2274_v16, %v3266_v50  ;;  %v3572_v20 = vrot.slane %v2290_v17, %v3266_v50  ;;  %v3575_v21 = vrot.slane %v2273_v33, %v3266_v50  ;;  %v3578_v22 = vrot.slane %v2289_v5, %v3266_v50  ;;  %v2776_v16 = vld [vmem:[%s3646_s10 + $0x8] sm:$0xff]  }
 0x4fb   :  { %2723 = vmatpush3.bf16.msra.mxu1 %v2776_v16 }
 0x4fc   :  { %v2307_v24 = vcombine.low %v3569_v18, %v3572_v20  ;;  %v2305_v59 = vcombine.low %v3575_v21, %v3578_v22  ;;  %v2306_v61 = vcombine.high %v3575_v21, %v3578_v22  ;;  %v2308_v26 = vcombine.high %v3569_v18, %v3572_v20  ;;  %v2548_v21 = vld [vmem:[%s3647_s11] ss:$0 sm:$0xff] }
 0x529   :  { %v1961_v35 = vpop.f32.mrb[28].mxu1  ;;  %v2007_v14 = vpop.f32.mrb[32].mxu0 }
 0x52a   :  { %v2700_v25 = vpop.f32.mrb[29].mxu1  ;;  %v2706_v27 = vpop.f32.mrb[33].mxu0 }
 0x52b   :  { %v1964_v28 = vpop.f32.mrb[30].mxu1  ;;  %v2010_v29 = vpop.f32.mrb[34].mxu0 }
 0x52c   :  { %v2701_v30 = vpop.f32.mrb[31].mxu1  ;;  %v2707_v3 = vpop.f32.mrb[35].mxu0 }
 0x531   :  { %v2053_v8 = vpop.f32.mrb[32].mxu1 }
 0x532   :  { %v2173_v31 = vcombine.low %v1961_v35, %v2053_v8  ;;  %v2174_v34 = vcombine.high %v1961_v35, %v2053_v8  ;;  %v2712_v36 = vpop.f32.mrb[33].mxu1 }
 0x533   :  { %v2056_v6 = vpop.f32.mrb[34].mxu1 }
 0x534   :  { %v2713_v37 = vpop.f32.mrb[35].mxu1  ;;  %v2181_v45 = vrot.slane %v2173_v31, %v3264_v43  ;;  %v2188_v46 = vrot.slane %v2174_v34, %v3264_v43 }
 0x551   :  { %v2099_v38 = vpop.f32.mrb[36].mxu0 }
 0x552   :  { %v2189_v39 = vcombine.low %v2007_v14, %v2099_v38  ;;  %v2190_v40 = vcombine.high %v2007_v14, %v2099_v38  ;;  %v2718_v42 = vpop.f32.mrb[37].mxu0 }
 0x553   :  { %v2102_v44 = vpop.f32.mrb[38].mxu0 }
 0x554   :  { %v2197_v47 = vrot.slane %v2189_v39, %v3264_v43  ;;  %v2204_v23 = vrot.slane %v2190_v40, %v3264_v43  ;;  %v2719_v41 = vpop.f32.mrb[39].mxu0 }
 0x556   :  { %v2205_v53 = vcombine.low %v2181_v45, %v2197_v47  ;;  %v2206_v2 = vcombine.high %v2181_v45, %v2197_v47  ;;  %v2221_v54 = vcombine.low %v2188_v46, %v2204_v23  ;;  %v2222_v55 = vcombine.high %v2188_v46, %v2204_v23 }
 0x558   :  { %v2213_v56 = vrot.slane %v2205_v53, %v3266_v50  ;;  %v2220_v48 = vrot.slane %v2206_v2, %v3266_v50  ;;  %v2229_v52 = vrot.slane %v2221_v54, %v3266_v50  ;;  %v2236_v57 = vrot.slane %v2222_v55, %v3266_v50 }
 0x55a   :  { %v2309_v58 = vcombine.low %v2213_v56, %v2220_v48  ;;  %v2546_v60 = vcombine.high %v2213_v56, %v2220_v48  ;;  %v2325_v62 = vcombine.low %v2229_v52, %v2236_v57  ;;  %v2547_v49 = vcombine.high %v2229_v52, %v2236_v57 }
 0x55c   :  { %v2316_v63 = vrot.slane %v2309_v58, %v3264_v43  ;;  %v2324_v1 = vrot.slane %v2546_v60, %v3264_v43  ;;  %v2332_v7 = vrot.slane %v2325_v62, %v3264_v43  ;;  %v2340_v9 = vrot.slane %v2547_v49, %v3264_v43 }
 0x55e   :  { %v2342_v19 = vcombine.high %v2316_v63, %v2324_v1  ;;  %v2358_v32 = vcombine.high %v2332_v7, %v2340_v9  ;;  %v2341_v4 = vcombine.low %v2316_v63, %v2324_v1  ;;  %v2357_v10 = vcombine.low %v2332_v7, %v2340_v9 }
 0x560   :  { %v2356_v11 = vrot.slane %v2342_v19, %v3266_v50  ;;  %v2372_v12 = vrot.slane %v2358_v32, %v3266_v50  ;;  %v2349_v13 = vrot.slane %v2341_v4, %v3266_v50  ;;  %v2365_v15 = vrot.slane %v2357_v10, %v3266_v50 }
 0x562   :  { %v2375_v43 = vcombine.low %v2356_v11, %v2372_v12  ;;  %v2374_v17 = vcombine.high %v2349_v13, %v2365_v15  ;;  %v2373_v33 = vcombine.low %v2349_v13, %v2365_v15  ;;  %v2376_v5 = vcombine.high %v2356_v11, %v2372_v12 }
 0x564   :  { %v2756_v18 = vpack.i.bf16 %v2375_v43, %v2307_v24  ;;  %v2751_v20 = vpack.i.bf16 %v2374_v17, %v2306_v61  ;;  %v2761_v0 = vpack.i.bf16 %v2376_v5, %v2308_v26 }
 0x566   :  { %2757 = vrot.lane.b32.xlu1 %v2756_v18, %s3013_s27  ;;  %2752 = vrot.lane.b32.xlu0 %v2751_v20, %s3014_s3 }
 0x56a   :  { %2762 = vrot.lane.b32.xlu0 %v2761_v0, %s3015_s24 }
 0x5d8   :  { %v2758_v50 = vpop.permute.xlu1 %2757  ;;  %v2753_v35 = vpop.permute.xlu0 %2752 }
 0x5d9   :  { %v2755_v14 = vunpack.i.h.bf16 %v2753_v35  ;;  %v2754_v25 = vunpack.i.l.bf16 %v2753_v35  ;;  %v2760_v27 = vunpack.i.h.bf16 %v2758_v50  ;;  %v2759_v28 = vunpack.i.l.bf16 %v2758_v50 }
 0x5db   :  { %v2401_v24 = vsel %vm1271_vm2, %v2305_v59, %v2754_v25  ;;  %v2402_v61 = vsel %vm1271_vm2, %v2373_v33, %v2755_v14 }
 0x5dc   :  { %v2763_v26 = vpop.permute.xlu0 %2762  ;;  %v2404_v3 = vsel %vm2403_vm4, %v2401_v24, %v2759_v28  ;;  %v2405_v8 = vsel %vm2403_vm4, %v2402_v61, %v2760_v27 }
 0x5dd   :  { %v2765_v29 = vunpack.i.h.bf16 %v2763_v26  ;;  %v2764_v30 = vunpack.i.l.bf16 %v2763_v26 }
 0x5df   :  { %v2407_v31 = vsel %vm2406_vm5, %v2404_v3, %v2764_v30  ;;  %v2408_v34 = vsel %vm2406_vm5, %v2405_v8, %v2765_v29 }
 0x5e0   :  { %v2409_v36 = vpack.c.bf16 %v2408_v34, %v2407_v31 }
 0x5e2   :  { %2725 = vmatmul.mubr.msk.bf16.vlgmr.msra.gmra.mrb[36].mxu1 %vm170_vm1, %v2409_v36 }
 0x6b5   :  { %v2470_v22 = vpop.f32.mrb[36].mxu1 }
 0x6b6   :  { %v2471_v59 = vadd.f32 %v2548_v21, %v2470_v22  ;;  %v2726_v6 = vpop.f32.mrb[37].mxu1 }
 0x6b7   :  { %v2473_v37 = vpop.f32.mrb[38].mxu1 }
 0x6b8   :  { %2477 = vst.msk [vmem:[#allocation14] sm:$0xff] %vm170_vm1, %v2471_v59  ;;  %v2474_v38 = vadd.f32 %v2548_v21, %v2473_v37  ;;  %v2727_v39 = vpop.f32.mrb[39].mxu1 }
 0x6ba   :  { %2478 = vst.msk [vmem:[#allocation14 + $0x8] sm:$0xff] %vm170_vm1, %v2474_v38 }
 0x6bb   :  { %2974 = shalt.err (!%p2971_p4)
}
 0x6bc   :  { %s2975_s18 = scalar_lea.hbm %s3648_s12, 256 }
 0x6bd   :  { %p2976_p5 = scmp.ne.s32.totalorder %s3648_s12, %s2975_s18  ;;  %p2979_p6 = scmp.lt.u32.totalorder %s2975_s18, %s3648_s12 }
 0x6bf   :  { %p2981_p7 = pnand %p2979_p6, %p2976_p5 }
 0x6c1   :  { %2984 = shalt.err (!%p2981_p7)
}
 0x6c2   :  { %s3017_s9 = smov 128  }
 0x6c3   :  { %2490 = dma.vmem_to_hbm [thread:$0]  %s2485_s22, 256, %s3648_s12, [#allocation4], %s3017_s9, %s3017_s9, %s3014_s3  }
 0x6c4   :  { %2993 = dma.done.wait [#allocation4], 256  }
 0x6c5   :  { %2994 = vsyncadd [#allocation4], 4294967040 }
 0x6c6   :  { %2494 = vsyncpa [#allocation3], 1 }
 0x6c7   :  { %2495 = vsyncpa [#allocation6], 1 }
 0x6c8   :  { %2496 = vsyncpa [#allocation9], 1 }
 0x6c9   :  { %2497 = vsyncpa [#allocation12], 1 }
 0x6ca   :  { %2498 = vsyncpa [#allocation4], 1 }

</bundles_post_ra>
